<compile_context>
chip_gen: v7x
topology: tpu7x:2x2x1
jax: 0.10.0
libtpu: 0.0.40
codegen_flags: <defaults>
</compile_context>

<pallas_src>
import jax
import jax.numpy as jnp
import numpy as np
from jax.experimental import pallas as pl
from jax.experimental.pallas import tpu as pltpu


# ----------------------------------------------------------------------------
# Fused kernel
# ----------------------------------------------------------------------------
def _lenet_fused_kernel(img_ref,
                        w1_ref, b1_ref, re1_ref, ro1_ref, ce1_ref, co1_ref,
                        w2_ref, b2_ref, re2_ref, ro2_ref, ce2_ref, co2_ref,
                        wf1_ref, bf1_ref, wf2_ref, bf2_ref, wf3_ref, bf3_ref,
                        out_ref):
    f32, bf16 = jnp.float32, jnp.bfloat16

    # ---- conv1: 1->6, k=5, pad=2, as ONE GEMM -------------------------------
    # Activation slab layout: rows = spatial y, cols = o*28 + x  (channels on
    # lanes -> lane-dense everything downstream, incl. the FC flatten).
    img = img_ref[...]                                        # (28, 28) f32
    zpad = jnp.zeros((2, 28), f32)
    imgrp = jnp.concatenate([zpad, img, zpad], axis=0)        # (32, 28) row-padded
    # shifted-row im2col stack: lhs1[y, 28*i + c] = imgrp[y+i, c]
    lhs1 = jnp.concatenate([imgrp[i:i + 28, :] for i in range(5)],
                           axis=1)                            # (28, 140)
    o1 = jnp.dot(lhs1.astype(bf16), w1_ref[...],
                 preferred_element_type=f32) + b1_ref[...]    # (28, 168)

    # ---- MaxPool2d(2,2) then Tanh -> (14, 6*14) -----------------------------
    m1 = jnp.maximum(jnp.dot(re1_ref[...], o1, preferred_element_type=f32),
                     jnp.dot(ro1_ref[...], o1, preferred_element_type=f32))
    p1 = jnp.tanh(jnp.maximum(
        jnp.dot(m1, ce1_ref[...], preferred_element_type=f32),
        jnp.dot(m1, co1_ref[...], preferred_element_type=f32)))   # (14, 84)

    # ---- conv2: 6->16, k=5, valid, as ONE GEMM ------------------------------
    lhs2 = jnp.concatenate([p1[i:i + 10, :] for i in range(5)],
                           axis=1)                            # (10, 420)
    o2 = jnp.dot(lhs2.astype(bf16), w2_ref[...],
                 preferred_element_type=f32) + b2_ref[...]    # (10, 160)

    # ---- MaxPool2d(2,2) then Tanh -> (5, 16*5) ------------------------------
    m2 = jnp.maximum(jnp.dot(re2_ref[...], o2, preferred_element_type=f32),
                     jnp.dot(ro2_ref[...], o2, preferred_element_type=f32))
    p2 = jnp.tanh(jnp.maximum(
        jnp.dot(m2, ce2_ref[...], preferred_element_type=f32),
        jnp.dot(m2, co2_ref[...], preferred_element_type=f32)))   # (5, 80)

    # ---- FC stack, lane-dense row-vector activations ------------------------
    # NCHW flatten order is baked into wf1's rows: flat[0, 80*y + 5*c + x].
    flat = jnp.concatenate([p2[i:i + 1, :] for i in range(5)],
                           axis=1)                            # (1, 400)
    h1 = jnp.tanh(jnp.dot(flat.astype(bf16), wf1_ref[...],
                          preferred_element_type=f32) + bf1_ref[...])  # (1, 120)
    h2 = jnp.tanh(jnp.dot(h1.astype(bf16), wf2_ref[...],
                          preferred_element_type=f32) + bf2_ref[...])  # (1, 84)
    out_ref[...] = (jnp.dot(h2.astype(bf16), wf3_ref[...],
                            preferred_element_type=f32)
                    + bf3_ref[...])                           # (1, 128), logits in [:, :10]


# ----------------------------------------------------------------------------
# One-time parameter preprocessing (all reshapes/transposes happen here)
# ----------------------------------------------------------------------------
def preprocess_params(params):
    f32, bf16 = jnp.float32, jnp.bfloat16
    w1 = np.asarray(params["w1"], np.float32)     # (6, 1, 5, 5)
    w2 = np.asarray(params["w2"], np.float32)     # (16, 6, 5, 5)
    wl1 = np.asarray(params["wl1"], np.float32)   # (120, 400)
    wl2 = np.asarray(params["wl2"], np.float32)   # (84, 120)
    wl3 = np.asarray(params["wl3"], np.float32)   # (10, 84)
    b1 = np.asarray(params["b1"], np.float32)
    b2 = np.asarray(params["b2"], np.float32)
    bl1 = np.asarray(params["bl1"], np.float32)
    bl2 = np.asarray(params["bl2"], np.float32)
    bl3 = np.asarray(params["bl3"], np.float32)

    # conv1 merged weight (140, 168):
    #   w1cat[28*i + c, 28*o + x] = w1[o, 0, i, c + 2 - x]    (0 <= c+2-x < 5)
    # (column padding of the image is folded in here; row padding is a cheap
    #  in-kernel concat with zeros.)
    jm = np.arange(28)[:, None] + 2 - np.arange(28)[None, :]          # (c, x)
    v1 = (jm >= 0) & (jm < 5)
    w1cat = (w1[:, 0][:, :, np.clip(jm, 0, 4)] * v1)                  # (o,i,c,x)
    w1cat = w1cat.transpose(1, 2, 0, 3).reshape(140, 168)

    # conv2 merged weight (420, 160):
    #   w2cat[84*i + 14*c + m, 10*o + x] = w2[o, c, i, m - x]  (0 <= m-x < 5)
    jm2 = np.arange(14)[:, None] - np.arange(10)[None, :]             # (m, x)
    v2 = (jm2 >= 0) & (jm2 < 5)
    w2cat = (w2[:, :, :, np.clip(jm2, 0, 4)] * v2)                    # (o,c,i,m,x)
    w2cat = w2cat.transpose(2, 1, 3, 0, 4).reshape(420, 160)

    # 2x2 / stride-2 max-pool selector matrices (exact 0/1, kept f32).
    def row_sel(n):
        h = np.arange(n // 2)[:, None]
        y = np.arange(n)[None, :]
        return ((y == 2 * h).astype(np.float32),
                (y == 2 * h + 1).astype(np.float32))

    def col_sel(n, ch):
        e, o = row_sel(n)
        eye = np.eye(ch, dtype=np.float32)
        return np.kron(eye, e.T), np.kron(eye, o.T)

    re1, ro1 = row_sel(28)          # (14, 28)
    ce1, co1 = col_sel(28, 6)       # (168, 84)
    re2, ro2 = row_sel(10)          # (5, 10)
    ce2, co2 = col_sel(10, 16)      # (160, 80)

    # fc1 with the NCHW flatten order baked into its rows:
    #   wf1[80*y + 5*c + x, n] = wl1[n, 25*c + 5*y + x]
    wf1 = wl1.reshape(120, 16, 5, 5).transpose(2, 1, 3, 0).reshape(400, 120)
    # fc3 transposed and zero-padded to 128 output lanes (lane-dense store).
    wf3 = np.zeros((84, 128), np.float32)
    wf3[:, :10] = wl3.T
    bf3 = np.zeros((1, 128), np.float32)
    bf3[0, :10] = bl3

    return {
        "w1cat": jnp.asarray(w1cat, bf16),
        "b1row": jnp.asarray(np.repeat(b1, 28)[None, :], f32),
        "re1": jnp.asarray(re1, f32), "ro1": jnp.asarray(ro1, f32),
        "ce1": jnp.asarray(ce1, f32), "co1": jnp.asarray(co1, f32),
        "w2cat": jnp.asarray(w2cat, bf16),
        "b2row": jnp.asarray(np.repeat(b2, 10)[None, :], f32),
        "re2": jnp.asarray(re2, f32), "ro2": jnp.asarray(ro2, f32),
        "ce2": jnp.asarray(ce2, f32), "co2": jnp.asarray(co2, f32),
        "wf1": jnp.asarray(wf1, bf16), "bf1": jnp.asarray(bl1[None, :], f32),
        "wf2": jnp.asarray(wl2.T, bf16), "bf2": jnp.asarray(bl2[None, :], f32),
        "wf3": jnp.asarray(wf3, bf16), "bf3": jnp.asarray(bf3, f32),
    }


# ----------------------------------------------------------------------------
# Forward wrappers
# ----------------------------------------------------------------------------
_VMEM = pl.BlockSpec(memory_space=pltpu.MemorySpace.VMEM)


@jax.jit
def img2num_logits(img, kp):
    """img viewed as (1, 1, 28, 28) like the torch forward; returns (1, 10)."""
    x = img.astype(jnp.float32).reshape(28, 28)
    z = pl.pallas_call(
        _lenet_fused_kernel,
        out_shape=jax.ShapeDtypeStruct((1, 128), jnp.float32),
        in_specs=[_VMEM] * 19,         # whole-array VMEM operands, no grid
        out_specs=_VMEM,
    )(x,
      kp["w1cat"], kp["b1row"], kp["re1"], kp["ro1"], kp["ce1"], kp["co1"],
      kp["w2cat"], kp["b2row"], kp["re2"], kp["ro2"], kp["ce2"], kp["co2"],
      kp["wf1"], kp["bf1"], kp["wf2"], kp["bf2"], kp["wf3"], kp["bf3"])
    return z[:, :10]


def img2num_forward(img, kparams):
    # int(torch.argmax(output)) - host-side glue, not a kernel hot path.
    return int(jnp.argmax(img2num_logits(img, kparams)))


# ----------------------------------------------------------------------------
# Parameter init (PyTorch-default style) and a pure-JAX reference for checking
# ----------------------------------------------------------------------------
def init_params(key):
    def uni(k, shape, fan_in):
        bound = 1.0 / jnp.sqrt(jnp.float32(fan_in))
        return jax.random.uniform(k, shape, jnp.float32, -bound, bound)

    ks = jax.random.split(key, 10)
    return {
        "w1": uni(ks[0], (6, 1, 5, 5), 25), "b1": uni(ks[1], (6,), 25),
        "w2": uni(ks[2], (16, 6, 5, 5), 150), "b2": uni(ks[3], (16,), 150),
        "wl1": uni(ks[4], (120, 400), 400), "bl1": uni(ks[5], (120,), 400),
        "wl2": uni(ks[6], (84, 120), 120), "bl2": uni(ks[7], (84,), 120),
        "wl3": uni(ks[8], (10, 84), 84), "bl3": uni(ks[9], (10,), 84),
    }


def reference_logits(img, params):
    """Straightforward JAX re-implementation of the torch module's forward."""
    hi = jax.lax.Precision.HIGHEST
    x = img.astype(jnp.float32).reshape(1, 1, 28, 28)
    y = jax.lax.conv_general_dilated(
        x, params["w1"], (1, 1), ((2, 2), (2, 2)),
        dimension_numbers=("NCHW", "OIHW", "NCHW"), precision=hi)
    y = y + params["b1"][None, :, None, None]
    y = y.reshape(1, 6, 14, 2, 14, 2).max(axis=(3, 5))
    y = jnp.tanh(y)
    y = jax.lax.conv_general_dilated(
        y, params["w2"], (1, 1), ((0, 0), (0, 0)),
        dimension_numbers=("NCHW", "OIHW", "NCHW"), precision=hi)
    y = y + params["b2"][None, :, None, None]
    y = y.reshape(1, 16, 5, 2, 5, 2).max(axis=(3, 5))
    y = jnp.tanh(y)
    flat = y.reshape(1, 400)
    h = jnp.tanh(flat @ params["wl1"].T + params["bl1"])
    h = jnp.tanh(h @ params["wl2"].T + params["bl2"])
    return h @ params["wl3"].T + params["bl3"]


# ----------------------------------------------------------------------------
if __name__ == "__main__":
    key = jax.random.PRNGKey(0)
    pkey, xkey = jax.random.split(key)
    params = init_params(pkey)
    kparams = preprocess_params(params)    # one-time weight transformation

    # MNIST-shaped deterministic input (module's forward views it as (1,1,28,28)).
    img = jax.random.normal(xkey, (28, 28), jnp.float32)

    logits = img2num_logits(img, kparams)
    jax.block_until_ready(logits)
    assert logits.shape == (1, 10)

    ref = reference_logits(img, params)
    # bf16 MXU operands with f32 accumulation -> keep a loose tolerance.
    np.testing.assert_allclose(np.asarray(logits), np.asarray(ref),
                               atol=3e-2, rtol=0.0)

    pred = img2num_forward(img, kparams)
    assert 0 <= pred < 10
    print("KERNEL_OK")
</pallas_src>

<mosaic_0001>
module attributes {stable_mosaic.version = 11 : i64} {
  func.func @_lenet_fused_kernel(%arg0: memref<28x28xf32, #tpu.memory_space<vmem>>, %arg1: memref<140x168xbf16, #tpu.memory_space<vmem>>, %arg2: memref<1x168xf32, #tpu.memory_space<vmem>>, %arg3: memref<14x28xf32, #tpu.memory_space<vmem>>, %arg4: memref<14x28xf32, #tpu.memory_space<vmem>>, %arg5: memref<168x84xf32, #tpu.memory_space<vmem>>, %arg6: memref<168x84xf32, #tpu.memory_space<vmem>>, %arg7: memref<420x160xbf16, #tpu.memory_space<vmem>>, %arg8: memref<1x160xf32, #tpu.memory_space<vmem>>, %arg9: memref<5x10xf32, #tpu.memory_space<vmem>>, %arg10: memref<5x10xf32, #tpu.memory_space<vmem>>, %arg11: memref<160x80xf32, #tpu.memory_space<vmem>>, %arg12: memref<160x80xf32, #tpu.memory_space<vmem>>, %arg13: memref<400x120xbf16, #tpu.memory_space<vmem>>, %arg14: memref<1x120xf32, #tpu.memory_space<vmem>>, %arg15: memref<120x84xbf16, #tpu.memory_space<vmem>>, %arg16: memref<1x84xf32, #tpu.memory_space<vmem>>, %arg17: memref<84x128xbf16, #tpu.memory_space<vmem>>, %arg18: memref<1x128xf32, #tpu.memory_space<vmem>>, %arg19: memref<1x128xf32, #tpu.memory_space<vmem>>) attributes {dimension_semantics = [], scalar_prefetch = 0 : i64, scratch_operands = 0 : i64, tpu.core_type = #tpu.core_type<tc>} {
    %c0 = arith.constant 0 : index
    %c0_0 = arith.constant 0 : index
    %0 = vector.load %arg0[%c0, %c0_0] : memref<28x28xf32, #tpu.memory_space<vmem>>, vector<28x28xf32>
    %cst = arith.constant 0.000000e+00 : f32
    %1 = vector.broadcast %cst : f32 to vector<2x28xf32>
    %2 = tpu.concatenate %1, %0, %1 in 0 : vector<2x28xf32>, vector<28x28xf32>, vector<2x28xf32> -> vector<32x28xf32>
    %3 = vector.extract_strided_slice %2 {offsets = [0, 0], sizes = [28, 28], strides = [1, 1]} : vector<32x28xf32> to vector<28x28xf32>
    %4 = vector.extract_strided_slice %2 {offsets = [1, 0], sizes = [28, 28], strides = [1, 1]} : vector<32x28xf32> to vector<28x28xf32>
    %5 = vector.extract_strided_slice %2 {offsets = [2, 0], sizes = [28, 28], strides = [1, 1]} : vector<32x28xf32> to vector<28x28xf32>
    %6 = vector.extract_strided_slice %2 {offsets = [3, 0], sizes = [28, 28], strides = [1, 1]} : vector<32x28xf32> to vector<28x28xf32>
    %7 = vector.extract_strided_slice %2 {offsets = [4, 0], sizes = [28, 28], strides = [1, 1]} : vector<32x28xf32> to vector<28x28xf32>
    %8 = tpu.concatenate %3, %4, %5, %6, %7 in 1 : vector<28x28xf32>, vector<28x28xf32>, vector<28x28xf32>, vector<28x28xf32>, vector<28x28xf32> -> vector<28x140xf32>
    %9 = arith.truncf %8 : vector<28x140xf32> to vector<28x140xbf16>
    %c0_1 = arith.constant 0 : index
    %c0_2 = arith.constant 0 : index
    %10 = vector.load %arg1[%c0_1, %c0_2] : memref<140x168xbf16, #tpu.memory_space<vmem>>, vector<140x168xbf16>
    %cst_3 = arith.constant dense<0.000000e+00> : vector<28x168xf32>
    %11 = tpu.matmul %9, %10, %cst_3 {dimension_numbers = #tpu.dot_dimension_numbers<[1], [0], [0], [1], [0, 0, 1, 1], [], []>} : vector<28x140xbf16>, vector<140x168xbf16>, vector<28x168xf32> -> vector<28x168xf32>
    %c0_4 = arith.constant 0 : index
    %c0_5 = arith.constant 0 : index
    %12 = vector.load %arg2[%c0_4, %c0_5] : memref<1x168xf32, #tpu.memory_space<vmem>>, vector<1x168xf32>
    %13 = vector.broadcast %12 : vector<1x168xf32> to vector<28x168xf32>
    %14 = arith.addf %11, %13 : vector<28x168xf32>
    %c0_6 = arith.constant 0 : index
    %c0_7 = arith.constant 0 : index
    %15 = vector.load %arg3[%c0_6, %c0_7] : memref<14x28xf32, #tpu.memory_space<vmem>>, vector<14x28xf32>
    %cst_8 = arith.constant dense<0.000000e+00> : vector<14x168xf32>
    %16 = tpu.matmul %15, %14, %cst_8 {dimension_numbers = #tpu.dot_dimension_numbers<[1], [0], [0], [1], [0, 0, 1, 1], [], []>} : vector<14x28xf32>, vector<28x168xf32>, vector<14x168xf32> -> vector<14x168xf32>
    %c0_9 = arith.constant 0 : index
    %c0_10 = arith.constant 0 : index
    %17 = vector.load %arg4[%c0_9, %c0_10] : memref<14x28xf32, #tpu.memory_space<vmem>>, vector<14x28xf32>
    %cst_11 = arith.constant dense<0.000000e+00> : vector<14x168xf32>
    %18 = tpu.matmul %17, %14, %cst_11 {dimension_numbers = #tpu.dot_dimension_numbers<[1], [0], [0], [1], [0, 0, 1, 1], [], []>} : vector<14x28xf32>, vector<28x168xf32>, vector<14x168xf32> -> vector<14x168xf32>
    %19 = arith.maximumf %16, %18 : vector<14x168xf32>
    %c0_12 = arith.constant 0 : index
    %c0_13 = arith.constant 0 : index
    %20 = vector.load %arg5[%c0_12, %c0_13] : memref<168x84xf32, #tpu.memory_space<vmem>>, vector<168x84xf32>
    %cst_14 = arith.constant dense<0.000000e+00> : vector<14x84xf32>
    %21 = tpu.matmul %19, %20, %cst_14 {dimension_numbers = #tpu.dot_dimension_numbers<[1], [0], [0], [1], [0, 0, 1, 1], [], []>} : vector<14x168xf32>, vector<168x84xf32>, vector<14x84xf32> -> vector<14x84xf32>
    %c0_15 = arith.constant 0 : index
    %c0_16 = arith.constant 0 : index
    %22 = vector.load %arg6[%c0_15, %c0_16] : memref<168x84xf32, #tpu.memory_space<vmem>>, vector<168x84xf32>
    %cst_17 = arith.constant dense<0.000000e+00> : vector<14x84xf32>
    %23 = tpu.matmul %19, %22, %cst_17 {dimension_numbers = #tpu.dot_dimension_numbers<[1], [0], [0], [1], [0, 0, 1, 1], [], []>} : vector<14x168xf32>, vector<168x84xf32>, vector<14x84xf32> -> vector<14x84xf32>
    %24 = arith.maximumf %21, %23 : vector<14x84xf32>
    %25 = math.tanh %24 : vector<14x84xf32>
    %26 = vector.extract_strided_slice %25 {offsets = [0, 0], sizes = [10, 84], strides = [1, 1]} : vector<14x84xf32> to vector<10x84xf32>
    %27 = vector.extract_strided_slice %25 {offsets = [1, 0], sizes = [10, 84], strides = [1, 1]} : vector<14x84xf32> to vector<10x84xf32>
    %28 = vector.extract_strided_slice %25 {offsets = [2, 0], sizes = [10, 84], strides = [1, 1]} : vector<14x84xf32> to vector<10x84xf32>
    %29 = vector.extract_strided_slice %25 {offsets = [3, 0], sizes = [10, 84], strides = [1, 1]} : vector<14x84xf32> to vector<10x84xf32>
    %30 = vector.extract_strided_slice %25 {offsets = [4, 0], sizes = [10, 84], strides = [1, 1]} : vector<14x84xf32> to vector<10x84xf32>
    %31 = tpu.concatenate %26, %27, %28, %29, %30 in 1 : vector<10x84xf32>, vector<10x84xf32>, vector<10x84xf32>, vector<10x84xf32>, vector<10x84xf32> -> vector<10x420xf32>
    %32 = arith.truncf %31 : vector<10x420xf32> to vector<10x420xbf16>
    %c0_18 = arith.constant 0 : index
    %c0_19 = arith.constant 0 : index
    %33 = vector.load %arg7[%c0_18, %c0_19] : memref<420x160xbf16, #tpu.memory_space<vmem>>, vector<420x160xbf16>
    %cst_20 = arith.constant dense<0.000000e+00> : vector<10x160xf32>
    %34 = tpu.matmul %32, %33, %cst_20 {dimension_numbers = #tpu.dot_dimension_numbers<[1], [0], [0], [1], [0, 0, 1, 1], [], []>} : vector<10x420xbf16>, vector<420x160xbf16>, vector<10x160xf32> -> vector<10x160xf32>
    %c0_21 = arith.constant 0 : index
    %c0_22 = arith.constant 0 : index
    %35 = vector.load %arg8[%c0_21, %c0_22] : memref<1x160xf32, #tpu.memory_space<vmem>>, vector<1x160xf32>
    %36 = vector.broadcast %35 : vector<1x160xf32> to vector<10x160xf32>
    %37 = arith.addf %34, %36 : vector<10x160xf32>
    %c0_23 = arith.constant 0 : index
    %c0_24 = arith.constant 0 : index
    %38 = vector.load %arg9[%c0_23, %c0_24] : memref<5x10xf32, #tpu.memory_space<vmem>>, vector<5x10xf32>
    %cst_25 = arith.constant dense<0.000000e+00> : vector<5x160xf32>
    %39 = tpu.matmul %38, %37, %cst_25 {dimension_numbers = #tpu.dot_dimension_numbers<[1], [0], [0], [1], [0, 0, 1, 1], [], []>} : vector<5x10xf32>, vector<10x160xf32>, vector<5x160xf32> -> vector<5x160xf32>
    %c0_26 = arith.constant 0 : index
    %c0_27 = arith.constant 0 : index
    %40 = vector.load %arg10[%c0_26, %c0_27] : memref<5x10xf32, #tpu.memory_space<vmem>>, vector<5x10xf32>
    %cst_28 = arith.constant dense<0.000000e+00> : vector<5x160xf32>
    %41 = tpu.matmul %40, %37, %cst_28 {dimension_numbers = #tpu.dot_dimension_numbers<[1], [0], [0], [1], [0, 0, 1, 1], [], []>} : vector<5x10xf32>, vector<10x160xf32>, vector<5x160xf32> -> vector<5x160xf32>
    %42 = arith.maximumf %39, %41 : vector<5x160xf32>
    %c0_29 = arith.constant 0 : index
    %c0_30 = arith.constant 0 : index
    %43 = vector.load %arg11[%c0_29, %c0_30] : memref<160x80xf32, #tpu.memory_space<vmem>>, vector<160x80xf32>
    %cst_31 = arith.constant dense<0.000000e+00> : vector<5x80xf32>
    %44 = tpu.matmul %42, %43, %cst_31 {dimension_numbers = #tpu.dot_dimension_numbers<[1], [0], [0], [1], [0, 0, 1, 1], [], []>} : vector<5x160xf32>, vector<160x80xf32>, vector<5x80xf32> -> vector<5x80xf32>
    %c0_32 = arith.constant 0 : index
    %c0_33 = arith.constant 0 : index
    %45 = vector.load %arg12[%c0_32, %c0_33] : memref<160x80xf32, #tpu.memory_space<vmem>>, vector<160x80xf32>
    %cst_34 = arith.constant dense<0.000000e+00> : vector<5x80xf32>
    %46 = tpu.matmul %42, %45, %cst_34 {dimension_numbers = #tpu.dot_dimension_numbers<[1], [0], [0], [1], [0, 0, 1, 1], [], []>} : vector<5x160xf32>, vector<160x80xf32>, vector<5x80xf32> -> vector<5x80xf32>
    %47 = arith.maximumf %44, %46 : vector<5x80xf32>
    %48 = math.tanh %47 : vector<5x80xf32>
    %49 = vector.extract_strided_slice %48 {offsets = [0, 0], sizes = [1, 80], strides = [1, 1]} : vector<5x80xf32> to vector<1x80xf32>
    %50 = vector.extract_strided_slice %48 {offsets = [1, 0], sizes = [1, 80], strides = [1, 1]} : vector<5x80xf32> to vector<1x80xf32>
    %51 = vector.extract_strided_slice %48 {offsets = [2, 0], sizes = [1, 80], strides = [1, 1]} : vector<5x80xf32> to vector<1x80xf32>
    %52 = vector.extract_strided_slice %48 {offsets = [3, 0], sizes = [1, 80], strides = [1, 1]} : vector<5x80xf32> to vector<1x80xf32>
    %53 = vector.extract_strided_slice %48 {offsets = [4, 0], sizes = [1, 80], strides = [1, 1]} : vector<5x80xf32> to vector<1x80xf32>
    %54 = tpu.concatenate %49, %50, %51, %52, %53 in 1 : vector<1x80xf32>, vector<1x80xf32>, vector<1x80xf32>, vector<1x80xf32>, vector<1x80xf32> -> vector<1x400xf32>
    %55 = arith.truncf %54 : vector<1x400xf32> to vector<1x400xbf16>
    %c0_35 = arith.constant 0 : index
    %c0_36 = arith.constant 0 : index
    %56 = vector.load %arg13[%c0_35, %c0_36] : memref<400x120xbf16, #tpu.memory_space<vmem>>, vector<400x120xbf16>
    %cst_37 = arith.constant dense<0.000000e+00> : vector<1x120xf32>
    %57 = tpu.matmul %55, %56, %cst_37 {dimension_numbers = #tpu.dot_dimension_numbers<[1], [0], [0], [1], [0, 0, 1, 1], [], []>} : vector<1x400xbf16>, vector<400x120xbf16>, vector<1x120xf32> -> vector<1x120xf32>
    %c0_38 = arith.constant 0 : index
    %c0_39 = arith.constant 0 : index
    %58 = vector.load %arg14[%c0_38, %c0_39] : memref<1x120xf32, #tpu.memory_space<vmem>>, vector<1x120xf32>
    %59 = arith.addf %57, %58 : vector<1x120xf32>
    %60 = math.tanh %59 : vector<1x120xf32>
    %61 = arith.truncf %60 : vector<1x120xf32> to vector<1x120xbf16>
    %c0_40 = arith.constant 0 : index
    %c0_41 = arith.constant 0 : index
    %62 = vector.load %arg15[%c0_40, %c0_41] : memref<120x84xbf16, #tpu.memory_space<vmem>>, vector<120x84xbf16>
    %cst_42 = arith.constant dense<0.000000e+00> : vector<1x84xf32>
    %63 = tpu.matmul %61, %62, %cst_42 {dimension_numbers = #tpu.dot_dimension_numbers<[1], [0], [0], [1], [0, 0, 1, 1], [], []>} : vector<1x120xbf16>, vector<120x84xbf16>, vector<1x84xf32> -> vector<1x84xf32>
    %c0_43 = arith.constant 0 : index
    %c0_44 = arith.constant 0 : index
    %64 = vector.load %arg16[%c0_43, %c0_44] : memref<1x84xf32, #tpu.memory_space<vmem>>, vector<1x84xf32>
    %65 = arith.addf %63, %64 : vector<1x84xf32>
    %66 = math.tanh %65 : vector<1x84xf32>
    %67 = arith.truncf %66 : vector<1x84xf32> to vector<1x84xbf16>
    %c0_45 = arith.constant 0 : index
    %c0_46 = arith.constant 0 : index
    %68 = vector.load %arg17[%c0_45, %c0_46] : memref<84x128xbf16, #tpu.memory_space<vmem>>, vector<84x128xbf16>
    %cst_47 = arith.constant dense<0.000000e+00> : vector<1x128xf32>
    %69 = tpu.matmul %67, %68, %cst_47 {dimension_numbers = #tpu.dot_dimension_numbers<[1], [0], [0], [1], [0, 0, 1, 1], [], []>} : vector<1x84xbf16>, vector<84x128xbf16>, vector<1x128xf32> -> vector<1x128xf32>
    %c0_48 = arith.constant 0 : index
    %c0_49 = arith.constant 0 : index
    %70 = vector.load %arg18[%c0_48, %c0_49] : memref<1x128xf32, #tpu.memory_space<vmem>>, vector<1x128xf32>
    %71 = arith.addf %69, %70 : vector<1x128xf32>
    %c0_50 = arith.constant 0 : index
    %c0_51 = arith.constant 0 : index
    %72 = vector.load %arg19[%c0_50, %c0_51] : memref<1x128xf32, #tpu.memory_space<vmem>>, vector<1x128xf32>
    tpu.vector_store %arg19[%c0_50, %c0_51], %71 {strides = array<i32>} : memref<1x128xf32, #tpu.memory_space<vmem>>, vector<1x128xf32>,
    return
  }
}

</mosaic_0001>

<bundles_post_ra>
// kernel: img2num_logits.1
= control target key start
LH: loop header
LB: loop body
LE: loop exit
PB: predicated region body
PF: predicated region fallthrough
CT: control target
= control target key end

     0   :  { %s4066_s0 = inlined_call_operand.hbm [shape: f32[28,28], index: 0, kind: input, shape index: {}]   ;;  %s4067_s1 = inlined_call_operand.hbm [shape: bf16[140,168], index: 1, kind: input, shape index: {}]   ;;  %s4068_s2 = inlined_call_operand.vmem [shape: f32[1,168], index: 2, kind: input, shape index: {}]   ;;  %s4069_s3 = inlined_call_operand.hbm [shape: f32[14,28], index: 3, kind: input, shape index: {}]   ;;  %s4070_s4 = inlined_call_operand.hbm [shape: f32[14,28], index: 4, kind: input, shape index: {}]   ;;  %s4071_s5 = inlined_call_operand.vmem [shape: f32[168,84], index: 5, kind: input, shape index: {}]   ;;  %s4072_s6 = inlined_call_operand.vmem [shape: f32[168,84], index: 6, kind: input, shape index: {}]   ;;  %s4073_s7 = inlined_call_operand.vmem [shape: bf16[420,160], index: 7, kind: input, shape index: {}]   ;;  %s4074_s8 = inlined_call_operand.hbm [shape: f32[1,160], index: 8, kind: input, shape index: {}]   ;;  %s4075_s9 = inlined_call_operand.hbm [shape: f32[5,10], index: 9, kind: input, shape index: {}]   ;;  %s4076_s10 = inlined_call_operand.hbm [shape: f32[5,10], index: 10, kind: input, shape index: {}]   ;;  %s4077_s11 = inlined_call_operand.vmem [shape: f32[160,80], index: 11, kind: input, shape index: {}]   ;;  %s4078_s12 = inlined_call_operand.vmem [shape: f32[160,80], index: 12, kind: input, shape index: {}]   ;;  %s4079_s13 = inlined_call_operand.vmem [shape: bf16[400,120], index: 13, kind: input, shape index: {}]   ;;  %s4080_s14 = inlined_call_operand.vmem [shape: f32[1,120], index: 14, kind: input, shape index: {}]   ;;  %s4081_s15 = inlined_call_operand.vmem [shape: bf16[120,84], index: 15, kind: input, shape index: {}]   ;;  %s4082_s16 = inlined_call_operand.hbm [shape: f32[1,84], index: 16, kind: input, shape index: {}]   ;;  %s4083_s17 = inlined_call_operand.vmem [shape: bf16[84,128], index: 17, kind: input, shape index: {}]   ;;  %s4084_s18 = inlined_call_operand.hbm [shape: f32[1,128], index: 18, kind: input, shape index: {}]   ;;  %s4085_s19 = inlined_call_operand.hbm [shape: f32[1,128], index: 19, kind: output, shape index: {}]  }
   0x1   :  { %4090 = sst [smem:[#allocation24_spill]] %s4066_s0 }
   0x2   :  { %4091 = sst [smem:[#allocation25_spill]] %s4067_s1 }
   0x3   :  { %4092 = sst [smem:[#allocation26_spill]] %s4068_s2 }
   0x4   :  { %4093 = sst [smem:[#allocation27_spill]] %s4069_s3 }
   0x5   :  { %4094 = sst [smem:[#allocation28_spill]] %s4085_s19 }
   0x6   :  { %24 = vsyncpa [#allocation3], 0 }
   0x7   :  { %25 = vsyncpa [#allocation6], 0 }
   0x8   :  { %26 = vsyncpa [#allocation9], 0 }
   0x9   :  { %27 = vsyncpa [#allocation12], 0 }
   0xa   :  { %28 = vsyncpa [#allocation15], 0 }
   0xb   :  { %29 = vsyncpa [#allocation4], 0  ;;  %s3075_s0 = smov [#allocation5]   ;;  %s3076_s20 = smov [#allocation8]  }
   0xc   :  { %s47_s30 = sshll.u32 %s3075_s0, 4  ;;  %s73_s21 = sshll.u32 %s3076_s20, 4  ;;  %s48_s30 = int_to_ptr.vmem [resolvable:$true] %s47_s30  ;;  %s3201_s21 = int_to_ptr.vmem [resolvable:$true] %s73_s21 }
   0xd   :  { %s4095_s2 = sld [smem:[#allocation25_spill]] }
  0x13   :  { %s2843_s23 = scalar_lea.hbm %s4095_s2, 2304 }
  0x14   :  { %p2844_p0 = scmp.ne.s32.totalorder %s4095_s2, %s2843_s23  ;;  %p2847_p1 = scmp.lt.u32.totalorder %s2843_s23, %s4095_s2 }
  0x16   :  { %p2849_p2 = pnand %p2847_p1, %p2844_p0 }
  0x18   :  { %2852 = shalt.err (!%p2849_p2)
}
  0x19   :  { %s2853_s27 = scalar_lea.vmem %s48_s30, 2304  ;;  %p2858_p4 = scmp.lt.s32.totalorder %s48_s30, %s48_s30 }
  0x1a   :  { %p2854_p3 = scmp.ne.s32.totalorder %s48_s30, %s2853_s27  ;;  %p2859_p5 = scmp.lt.s32.totalorder %s2853_s27, %s2853_s27 }
  0x1c   :  { %p2860_p6 = por %p2859_p5, %p2858_p4 }
  0x1e   :  { %p2861_p7 = pnand %p2860_p6, %p2854_p3 }
  0x20   :  { %2864 = shalt.err (!%p2861_p7)
}
  0x21   :  { %s3077_s28 = smov 128   ;;  %s3078_s29 = smov 8  }
  0x22   :  { %53 = dma.hbm_to_vmem [thread:$0]  %s4095_s2, 2304, %s48_s30, [#allocation6], %s3077_s28, %s3077_s28, %s3078_s29  }
  0x23   :  { %s2865_s23 = scalar_lea.hbm %s4070_s4, 256 }
  0x24   :  { %p2866_p8 = scmp.ne.s32.totalorder %s4070_s4, %s2865_s23  ;;  %p2869_p9 = scmp.lt.u32.totalorder %s2865_s23, %s4070_s4 }
  0x26   :  { %p2871_p10 = pnand %p2869_p9, %p2866_p8 }
  0x28   :  { %2874 = shalt.err (!%p2871_p10)
}
  0x29   :  { %s2875_s27 = scalar_lea.vmem %s3201_s21, 256  ;;  %p2880_p12 = scmp.lt.s32.totalorder %s3201_s21, %s3201_s21 }
  0x2a   :  { %p2876_p11 = scmp.ne.s32.totalorder %s3201_s21, %s2875_s27  ;;  %p2881_p13 = scmp.lt.s32.totalorder %s2875_s27, %s2875_s27 }
  0x2c   :  { %p2882_p0 = por %p2881_p13, %p2880_p12 }
  0x2e   :  { %p2883_p1 = pnand %p2882_p0, %p2876_p11 }
  0x30   :  { %2886 = shalt.err (!%p2883_p1)
}
  0x31   :  { %79 = dma.hbm_to_vmem [thread:$0]  %s4070_s4, 256, %s3201_s21, [#allocation9], %s3077_s28, %s3077_s28, %s3078_s29  }
  0x32   :  { %s3079_s0 = smov [#allocation11]   ;;  %s3080_s1 = smov [#allocation14]  }
  0x33   :  { %s102_s20 = sshll.u32 %s3079_s0, 4  ;;  %s132_s22 = sshll.u32 %s3080_s1, 4  ;;  %s103_s20 = int_to_ptr.vmem [resolvable:$true] %s102_s20  ;;  %s133_s22 = int_to_ptr.vmem [resolvable:$true] %s132_s22 }
  0x34   :  { %s2887_s25 = scalar_lea.hbm %s4075_s9, 128 }
  0x35   :  { %p2888_p2 = scmp.ne.s32.totalorder %s4075_s9, %s2887_s25  ;;  %p2891_p3 = scmp.lt.u32.totalorder %s2887_s25, %s4075_s9 }
  0x37   :  { %p2893_p4 = pnand %p2891_p3, %p2888_p2 }
  0x39   :  { %2896 = shalt.err (!%p2893_p4)
}
  0x3a   :  { %s2897_s4 = scalar_lea.vmem %s103_s20, 128  ;;  %p2902_p6 = scmp.lt.s32.totalorder %s103_s20, %s103_s20 }
  0x3b   :  { %p2898_p5 = scmp.ne.s32.totalorder %s103_s20, %s2897_s4  ;;  %p2903_p7 = scmp.lt.s32.totalorder %s2897_s4, %s2897_s4 }
  0x3d   :  { %p2904_p8 = por %p2903_p7, %p2902_p6 }
  0x3f   :  { %p2905_p9 = pnand %p2904_p8, %p2898_p5 }
  0x41   :  { %2908 = shalt.err (!%p2905_p9)
}
  0x42   :  { %105 = dma.hbm_to_vmem [thread:$0]  %s4075_s9, 128, %s103_s20, [#allocation12]  }
  0x43   :  { %s2909_s1 = scalar_lea.hbm %s4082_s16, 16 }
  0x44   :  { %p2910_p10 = scmp.ne.s32.totalorder %s4082_s16, %s2909_s1  ;;  %p2913_p11 = scmp.lt.u32.totalorder %s2909_s1, %s4082_s16 }
  0x46   :  { %p2915_p12 = pnand %p2913_p11, %p2910_p10 }
  0x48   :  { %2918 = shalt.err (!%p2915_p12)
}
  0x49   :  { %s2919_s3 = scalar_lea.vmem %s133_s22, 16  ;;  %s2923_s26 = scalar_lea.vmem %s133_s22, 32 }
  0x4a   :  { %p2920_p13 = scmp.ne.s32.totalorder %s133_s22, %s2919_s3  ;;  %p2924_p0 = scmp.lt.s32.totalorder %s133_s22, %s133_s22 }
  0x4b   :  { %p2925_p1 = scmp.lt.s32.totalorder %s2923_s26, %s2919_s3 }
  0x4d   :  { %p2926_p2 = por %p2925_p1, %p2924_p0 }
  0x4f   :  { %p2927_p3 = pnand %p2926_p2, %p2920_p13 }
  0x51   :  { %2930 = shalt.err (!%p2927_p3)
}
  0x52   :  { %135 = dma.hbm_to_vmem [thread:$0]  %s4082_s16, 16, %s133_s22, [#allocation15]  }
  0x53   :  { %s3081_s27 = smov [#allocation2]   ;;  %s3082_s21 = smov [#allocation7]  }
  0x54   :  { %s35_s4 = sshll.u32 %s3081_s27, 4  ;;  %s61_s30 = sshll.u32 %s3082_s21, 4  ;;  %s36_s4 = int_to_ptr.vmem [resolvable:$true] %s35_s4  ;;  %s3262_s30 = int_to_ptr.vmem [resolvable:$true] %s61_s30 }
  0x55   :  { %s4096_s1 = sld [smem:[#allocation24_spill]] }
  0x5b   :  { %s2931_s23 = scalar_lea.hbm %s4096_s1, 512 }
  0x5c   :  { %p2932_p4 = scmp.ne.s32.totalorder %s4096_s1, %s2931_s23  ;;  %p2935_p5 = scmp.lt.u32.totalorder %s2931_s23, %s4096_s1 }
  0x5e   :  { %p2937_p6 = pnand %p2935_p5, %p2932_p4 }
  0x60   :  { %2940 = shalt.err (!%p2937_p6)
}
  0x61   :  { %s2941_s16 = scalar_lea.vmem %s36_s4, 512  ;;  %p2946_p8 = scmp.lt.s32.totalorder %s36_s4, %s36_s4 }
  0x62   :  { %p2942_p7 = scmp.ne.s32.totalorder %s36_s4, %s2941_s16  ;;  %p2947_p9 = scmp.lt.s32.totalorder %s2941_s16, %s2941_s16 }
  0x64   :  { %p2948_p10 = por %p2947_p9, %p2946_p8 }
  0x66   :  { %p2949_p11 = pnand %p2948_p10, %p2942_p7 }
  0x68   :  { %2952 = shalt.err (!%p2949_p11)
}
  0x69   :  { %41 = dma.hbm_to_vmem [thread:$0]  %s4096_s1, 512, %s36_s4, [#allocation3], %s3077_s28, %s3077_s28, %s3078_s29  }
  0x6a   :  { %s4097_s27 = sld [smem:[#allocation27_spill]] }
  0x70   :  { %s2953_s21 = scalar_lea.hbm %s4097_s27, 256 }
  0x71   :  { %p2954_p12 = scmp.ne.s32.totalorder %s4097_s27, %s2953_s21  ;;  %p2957_p13 = scmp.lt.u32.totalorder %s2953_s21, %s4097_s27 }
  0x73   :  { %p2959_p0 = pnand %p2957_p13, %p2954_p12 }
  0x75   :  { %2962 = shalt.err (!%p2959_p0)
}
  0x76   :  { %s2963_s24 = scalar_lea.vmem %s3262_s30, 256  ;;  %p2968_p2 = scmp.lt.s32.totalorder %s3262_s30, %s3262_s30 }
  0x77   :  { %p2964_p1 = scmp.ne.s32.totalorder %s3262_s30, %s2963_s24  ;;  %p2969_p3 = scmp.lt.s32.totalorder %s2963_s24, %s2963_s24 }
  0x79   :  { %p2970_p4 = por %p2969_p3, %p2968_p2 }
  0x7b   :  { %p2971_p5 = pnand %p2970_p4, %p2964_p1 }
  0x7d   :  { %2974 = shalt.err (!%p2971_p5)
}
  0x7e   :  { %67 = dma.hbm_to_vmem [thread:$0]  %s4097_s27, 256, %s3262_s30, [#allocation6], %s3077_s28, %s3077_s28, %s3078_s29  }
  0x7f   :  { %s3083_s25 = smov [#allocation10]   ;;  %s3084_s16 = smov [#allocation13]  }
  0x80   :  { %s92_s3 = sshll.u32 %s3083_s25, 4  ;;  %s112_s22 = sshll.u32 %s3084_s16, 4  ;;  %s93_s3 = int_to_ptr.vmem [resolvable:$true] %s92_s3  ;;  %s113_s22 = int_to_ptr.vmem [resolvable:$true] %s112_s22 }
  0x81   :  { %s2975_s20 = scalar_lea.hbm %s4074_s8, 32 }
  0x82   :  { %p2976_p6 = scmp.ne.s32.totalorder %s4074_s8, %s2975_s20  ;;  %p2979_p7 = scmp.lt.u32.totalorder %s2975_s20, %s4074_s8 }
  0x84   :  { %p2981_p8 = pnand %p2979_p7, %p2976_p6 }
  0x86   :  { %2984 = shalt.err (!%p2981_p8)
}
  0x87   :  { %s2985_s28 = scalar_lea.vmem %s93_s3, 32  ;;  %p2990_p10 = scmp.lt.s32.totalorder %s93_s3, %s93_s3 }
  0x88   :  { %p2986_p9 = scmp.ne.s32.totalorder %s93_s3, %s2985_s28  ;;  %p2991_p11 = scmp.lt.s32.totalorder %s2985_s28, %s2985_s28 }
  0x8a   :  { %p2992_p12 = por %p2991_p11, %p2990_p10 }
  0x8c   :  { %p2993_p13 = pnand %p2992_p12, %p2986_p9 }
  0x8e   :  { %2996 = shalt.err (!%p2993_p13)
}
  0x8f   :  { %95 = dma.hbm_to_vmem [thread:$0]  %s4074_s8, 32, %s93_s3, [#allocation9]  }
  0x90   :  { %s2997_s24 = scalar_lea.hbm %s4076_s10, 128 }
  0x91   :  { %p2998_p0 = scmp.ne.s32.totalorder %s4076_s10, %s2997_s24  ;;  %p3001_p1 = scmp.lt.u32.totalorder %s2997_s24, %s4076_s10 }
  0x93   :  { %p3003_p2 = pnand %p3001_p1, %p2998_p0 }
  0x95   :  { %3006 = shalt.err (!%p3003_p2)
}
  0x96   :  { %s3007_s26 = scalar_lea.vmem %s113_s22, 128  ;;  %p3012_p4 = scmp.lt.s32.totalorder %s113_s22, %s113_s22 }
  0x97   :  { %p3008_p3 = scmp.ne.s32.totalorder %s113_s22, %s3007_s26  ;;  %p3013_p5 = scmp.lt.s32.totalorder %s3007_s26, %s3007_s26 }
  0x99   :  { %p3014_p6 = por %p3013_p5, %p3012_p4 }
  0x9b   :  { %p3015_p7 = pnand %p3014_p6, %p3008_p3 }
  0x9d   :  { %3018 = shalt.err (!%p3015_p7)
}
  0x9e   :  { %115 = dma.hbm_to_vmem [thread:$0]  %s4076_s10, 128, %s113_s22, [#allocation12]  }
  0x9f   :  { %s3085_s9 = smov [#allocation16]   ;;  %s3019_s0 = scalar_lea.hbm %s4084_s18, 16 }
  0xa0   :  { %s144_s20 = sshll.u32 %s3085_s9, 4  ;;  %p3020_p8 = scmp.ne.s32.totalorder %s4084_s18, %s3019_s0  ;;  %s145_s20 = int_to_ptr.vmem [resolvable:$true] %s144_s20 }
  0xa1   :  { %p3023_p9 = scmp.lt.u32.totalorder %s3019_s0, %s4084_s18 }
  0xa3   :  { %p3025_p10 = pnand %p3023_p9, %p3020_p8 }
  0xa5   :  { %3028 = shalt.err (!%p3025_p10)
}
  0xa6   :  { %s3029_s27 = scalar_lea.vmem %s145_s20, 16  ;;  %s3033_s10 = scalar_lea.vmem %s145_s20, 32 }
  0xa7   :  { %p3030_p11 = scmp.ne.s32.totalorder %s145_s20, %s3029_s27  ;;  %p3034_p12 = scmp.lt.s32.totalorder %s145_s20, %s145_s20 }
  0xa8   :  { %p3035_p13 = scmp.lt.s32.totalorder %s3033_s10, %s3029_s27 }
  0xaa   :  { %p3036_p0 = por %p3035_p13, %p3034_p12 }
  0xac   :  { %p3037_p1 = pnand %p3036_p0, %p3030_p11 }
  0xae   :  { %3040 = shalt.err (!%p3037_p1)
}
  0xaf   :  { %147 = dma.hbm_to_vmem [thread:$0]  %s4084_s18, 16, %s145_s20, [#allocation15]  }
  0xb0   :  { %3063 = dma.done.wait [#allocation3], 512  }
  0xb1   :  { %3064 = vsyncadd [#allocation3], 4294966784 }
  0xb2   :  { %3065 = dma.done.wait [#allocation6], 2560  }
  0xb3   :  { %3066 = vsyncadd [#allocation6], 4294964736 }
  0xb4   :  { %3067 = dma.done.wait [#allocation9], 288  }
  0xb5   :  { %3068 = vsyncadd [#allocation9], 4294967008 }
  0xb6   :  { %3069 = dma.done.wait [#allocation12], 256  }
  0xb7   :  { %3070 = vsyncadd [#allocation12], 4294967040 }
  0xb8   :  { %3071 = dma.done.wait [#allocation15], 32  }
  0xb9   :  { %3072 = vsyncadd [#allocation15], 4294967264  ;;  %vm184_vm0 = vcmask 1041408   ;;  %v176_v0 = vld [vmem:[#allocation2] sm:$0xff]  ;;  %v177_v1 = vld [vmem:[#allocation2 + $0x8] sm:$0xff]  ;;  %vm201_vm1 = vcmask 1046528  }
  0xba   :  { %v178_v2 = vld [vmem:[#allocation2 + $0x10] sm:$0xff]  ;;  %vm240_vm2 = vcmask 1044480   ;;  %vm197_vm3 = vcmask 1045504   ;;  %v185_v3 = vrot.slane %v176_v0, 6  ;;  %v186_v4 = vrot.slane %v177_v1, 6  ;;  %s3086_s18 = smov 28  }
  0xbb   :  { %v188_v5 = vrot.slane %v178_v2, 6  ;;  %v179_v6 = vld [vmem:[#allocation2 + $0x18] sm:$0xf]  ;;  %vm260_vm4 = vcmask 1043456   ;;  %v2687_v7 = vld [vmem:[#allocation5 + $0x4] ss:$8 sps:$4 sm:$0xff]  }
  0xbc   :  { %v2689_v8 = vld [vmem:[#allocation5] ss:$8 sps:$4 sm:$0xff]   ;;  %v3336_v9 = vsel %vm184_vm0, %v185_v3, %v186_v4  ;;  %v3342_v11 = vsel %vm184_vm0, 0.0, %v185_v3  ;;  %v190_v12 = vrot.slane %v179_v6, 6  ;;  %v2690_v13 = vld [vmem:[#allocation5 + $0x14] ss:$8 sps:$4 sm:$0xff]   ;;  %435 = vmatprep.subr.bf16.mxu0 %v2687_v7 }
  0xbd   :  { %v3339_v10 = vsel %vm184_vm0, %v186_v4, %v188_v5  ;;  %v202_v14 = vrot.slane %v3342_v11, 1  ;;  %v203_v15 = vrot.slane %v3336_v9, 1  ;;  %v241_v17 = vrot.slane %v3342_v11, 3  ;;  %v2692_v18 = vld [vmem:[#allocation5 + $0x10] ss:$8 sps:$4 sm:$0xff]   ;;  %436 = vmatpush1.bf16.msra.mxu0 %v2689_v8  ;;  %s3087_s24 = smov 84  }
  0xbe   :  { %v205_v16 = vrot.slane %v3339_v10, 1  ;;  %v242_v19 = vrot.slane %v3336_v9, 3  ;;  %v244_v20 = vrot.slane %v3339_v10, 3  ;;  %v221_v21 = vrot.slane %v3342_v11, 2  ;;  %437 = vmatprep.subr.bf16.mxu0 %v2690_v13  ;;  %v2693_v27 = vld [vmem:[#allocation5 + $0x24] ss:$8 sps:$4 sm:$0xff]  }
  0xbf   :  { %v222_v22 = vrot.slane %v3336_v9, 2  ;;  %v204_v23 = vsel %vm201_vm1, %v202_v14, %v203_v15  ;;  %v224_v25 = vrot.slane %v3339_v10, 2  ;;  %v261_v26 = vrot.slane %v3342_v11, 4  ;;  %v2695_v38 = vld [vmem:[#allocation5 + $0x20] ss:$8 sps:$4 sm:$0xff]   ;;  %s3088_s4 = smov 56  }
  0xc0   :  { %v206_v24 = vsel %vm201_vm1, %v203_v15, %v205_v16  ;;  %v243_v29 = vsel %vm240_vm2, %v241_v17, %v242_v19  ;;  %v245_v30 = vsel %vm240_vm2, %v242_v19, %v244_v20  ;;  %v262_v34 = vrot.slane %v3336_v9, 4  ;;  %v2696_v42 = vld [vmem:[#allocation5 + $0x34] ss:$8 sps:$4 sm:$0xff]   ;;  %v2698_v50 = vld [vmem:[#allocation5 + $0x30] ss:$8 sps:$4 sm:$0xff]   ;;  %s3089_s1 = smov 112  }
  0xc1   :  { %v2627_v28 = vpack.i.bf16 %v206_v24, %v204_v23  ;;  %v223_v31 = vsel %vm197_vm3, %v221_v21, %v222_v22  ;;  %v2637_v32 = vpack.i.bf16 %v245_v30, %v243_v29  ;;  %v225_v33 = vsel %vm197_vm3, %v222_v22, %v224_v25  ;;  %438 = vmatpush1.bf16.msra.mxu0 %v2692_v18  ;;  %v2699_v54 = vld [vmem:[#allocation5 + $0x44] ss:$8 sps:$4 sm:$0xff]   ;;  %v2701_v56 = vld [vmem:[#allocation5 + $0x40] ss:$8 sps:$4 sm:$0xff]   ;;  %v2702_v57 = vld [vmem:[#allocation5 + $0x54] ss:$8 sps:$4 sm:$0xff]  }
  0xc2   :  { %v264_v35 = vrot.slane %v3339_v10, 4  ;;  %v2632_v36 = vpack.i.bf16 %v225_v33, %v223_v31  ;;  %v191_v37 = vsel %vm184_vm0, %v188_v5, %v190_v12  ;;  %v263_v39 = vsel %vm260_vm4, %v261_v26, %v262_v34  ;;  %439 = vmatprep.subr.bf16.mxu0 %v2693_v27  ;;  %v2704_v60 = vld [vmem:[#allocation5 + $0x50] ss:$8 sps:$4 sm:$0xff]   ;;  %v2705_v61 = vld [vmem:[#allocation5 + $0x64] ss:$8 sps:$4 sm:$0xff]   ;;  %s4098_s23 = sld [smem:[#allocation26_spill]] }
  0xc3   :  { %2628 = vrot.lane.b32.xlu0 %v2627_v28, %s3086_s18  ;;  %2638 = vrot.lane.b32.xlu1 %v2637_v32, %s3087_s24  ;;  %v3368_v41 = vsel %vm197_vm3, %v191_v37, 0.0  ;;  %v2707_v62 = vld [vmem:[#allocation5 + $0x60] ss:$8 sps:$4 sm:$0xff]   ;;  %v2708_v63 = vld [vmem:[#allocation5 + $0x74] ss:$8 sps:$4 sm:$0xff]   ;;  %vm280_vm5 = vcmask 228352  }
  0xc4   :  { %v265_v40 = vsel %vm260_vm4, %v262_v34, %v264_v35  ;;  %v207_v44 = vrot.slane %v3368_v41, 1  ;;  %v226_v45 = vrot.slane %v3368_v41, 2  ;;  %v246_v46 = vrot.slane %v3368_v41, 3  ;;  %v2713_v0 = vld [vmem:[#allocation5 + $0x80] ss:$8 sps:$4 sm:$0x3f]  }
  0xc5   :  { %v2642_v43 = vpack.i.bf16 %v265_v40, %v263_v39  ;;  %v266_v47 = vrot.slane %v3368_v41, 4  ;;  %440 = vmatpush1.bf16.msra.mxu0 %v2695_v38  ;;  %v2710_v1 = vld [vmem:[#allocation5 + $0x70] ss:$8 sps:$4 sm:$0xff]   ;;  %v2711_v2 = vld [vmem:[#allocation5 + $0x84] ss:$8 sps:$4 sm:$0x3f]  }
  0xc6   :  { %v208_v48 = vsel %vm201_vm1, %v205_v16, %v207_v44  ;;  %v227_v49 = vsel %vm197_vm3, %v224_v25, %v226_v45  ;;  %v247_v53 = vsel %vm240_vm2, %v244_v20, %v246_v46  ;;  %441 = vmatprep.subr.bf16.mxu0 %v2696_v42  ;;  %v430_v3 = vsel %vm197_vm3, %v2713_v0, 0  ;;  %s3095_s21 = smov 124   ;;  %s3097_s28 = smov 32  }
  0xc7   :  { %2633 = vrot.lane.b32.xlu0 %v2632_v36, %s3088_s4  ;;  %2643 = vrot.lane.b32.xlu1 %v2642_v43, %s3089_s1  ;;  %v2647_v51 = vpack.i.bf16 %v207_v44, %v208_v48  ;;  %v2652_v52 = vpack.i.bf16 %v226_v45, %v227_v49  ;;  %v267_v55 = vsel %vm260_vm4, %v264_v35, %v266_v47  ;;  %vm285_vm6 = vcmask 457728   ;;  %v771_v49 = vld [vmem:[%s4072_s6] sm:$0xff]  ;;  %s3098_s29 = smov 64  }
  0xc8   :  { %v2657_v58 = vpack.i.bf16 %v246_v46, %v247_v53  ;;  %v2662_v59 = vpack.i.bf16 %v266_v47, %v267_v55  ;;  %vm290_vm7 = vcmask 687104   ;;  %vm295_vm8 = vcmask 916480   ;;  %v773_v53 = vld [vmem:[%s4072_s6 + $0x10] sm:$0xff] }
  0xc9   :  { %442 = vmatpush1.bf16.msra.mxu0 %v2698_v50  ;;  %vm422_vm9 = vcmask 97280   ;;  %v3090_v48 = vmov 0.0   ;;  %v3091_v50 = vmov 0.0|0.0   ;;  %vm3092_vm10 = vmmov 1  }
  0xca   :  { %443 = vmatprep.subr.bf16.mxu0 %v2699_v54  ;;  %566 = vmatprep.mubr.f32.mxu1 %v3090_v48  ;;  %v774_v54 = vld [vmem:[%s4072_s6 + $0x18] sm:$0xff]  ;;  %vm2446_vm11 = vmpackc.low %vm260_vm4, %vm3092_vm10  ;;  %vm689_vm12 = vcmask 326656   ;;  %vm913_vm13 = vcmask 1014784   ;;  %vm1253_vm14 = vcmask 293888   ;;  %vm916_vm15 = vcmask 654336  }
  0xcb   :  { %2648 = vrot.lane.b32.xlu0 %v2647_v51, %s3086_s18  ;;  %2653 = vrot.lane.b32.xlu1 %v2652_v52, %s3088_s4  ;;  %v772_v51 = vld [vmem:[%s4072_s6 + $0x8] sm:$0xff]  ;;  %v2495_v55 = vpack.c.bf16 %v774_v54, %v773_v53 }
  0xcc   :  { %v2492_v52 = vpack.c.bf16 %v772_v51, %v771_v49  ;;  %v675_v49 = vld [vmem:[%s4071_s5 + $0x38] sm:$0xff]  ;;  %v677_v53 = vld [vmem:[%s4071_s5 + $0x48] sm:$0xff] }
  0xcd   :  { %444 = vmatpush1.bf16.msra.mxu0 %v2701_v56  ;;  %v775_v56 = vld [vmem:[%s4072_s6 + $0x20] sm:$0xff] }
  0xce   :  { %445 = vmatprep.subr.bf16.mxu0 %v2702_v57  ;;  %v776_v57 = vld [vmem:[%s4072_s6 + $0x28] sm:$0xff] }
  0xcf   :  { %2658 = vrot.lane.b32.xlu0 %v2657_v58, %s3087_s24  ;;  %2663 = vrot.lane.b32.xlu1 %v2662_v59, %s3089_s1  ;;  %v2498_v58 = vpack.c.bf16 %v776_v57, %v775_v56  ;;  %v777_v59 = vld [vmem:[%s4072_s6 + $0x30] sm:$0xff]  ;;  %v679_v56 = vld [vmem:[%s4071_s5 + $0x58] sm:$0xff] }
  0xd1   :  { %446 = vmatpush1.bf16.msra.mxu0 %v2704_v60  ;;  %v778_v60 = vld [vmem:[%s4072_s6 + $0x38] sm:$0xff] }
  0xd2   :  { %447 = vmatprep.subr.bf16.mxu0 %v2705_v61  ;;  %v2501_v61 = vpack.c.bf16 %v778_v60, %v777_v59  ;;  %v681_v59 = vld [vmem:[%s4071_s5 + $0x68] sm:$0xff] }
  0xd5   :  { %448 = vmatpush1.bf16.msra.mxu0 %v2707_v62  ;;  %v779_v62 = vld [vmem:[%s4072_s6 + $0x40] sm:$0xff] }
  0xd6   :  { %449 = vmatprep.subr.bf16.mxu0 %v2708_v63  ;;  %v780_v63 = vld [vmem:[%s4072_s6 + $0x48] sm:$0xff] }
  0xd7   :  { %v2504_v0 = vpack.c.bf16 %v780_v63, %v779_v62  ;;  %v683_v62 = vld [vmem:[%s4071_s5 + $0x78] sm:$0xff]  ;;  %v785_v63 = vld [vmem:[%s4072_s6 + $0x70] sm:$0xff] }
  0xd9   :  { %450 = vmatpush1.bf16.msra.mxu0 %v2710_v1  ;;  %v781_v1 = vld [vmem:[%s4072_s6 + $0x50] sm:$0xff] }
  0xda   :  { %2246 = vmatprep.subr.msk.bf16.mxu0 %vm197_vm3, %v2711_v2  ;;  %v782_v2 = vld [vmem:[%s4072_s6 + $0x58] sm:$0xff] }
  0xdd   :  { %452 = vmatpush1.bf16.msra.mxu0 %v430_v3  ;;  %v2507_v3 = vpack.c.bf16 %v782_v2, %v781_v1  ;;  %v786_v1 = vld [vmem:[%s4072_s6 + $0x78] sm:$0xff] }
  0xde   :  { %2491 = vmatprep.subr.bf16.mxu0 %v3091_v50  ;;  %v2513_v2 = vpack.c.bf16 %v786_v1, %v785_v63 }
 0x135   :  { %v2629_v4 = vpop.permute.xlu0 %2628  ;;  %v2639_v5 = vpop.permute.xlu1 %2638 }
 0x136   :  { %v2631_v6 = vunpack.i.h.bf16 %v2629_v4  ;;  %v2630_v7 = vunpack.i.l.bf16 %v2629_v4  ;;  %v2641_v12 = vunpack.i.h.bf16 %v2639_v5  ;;  %v2640_v13 = vunpack.i.l.bf16 %v2639_v5  ;;  %v783_v4 = vld [vmem:[%s4072_s6 + $0x60] sm:$0xff]  ;;  %v784_v5 = vld [vmem:[%s4072_s6 + $0x68] sm:$0xff] }
 0x138   :  { %v282_v17 = vsel %vm280_vm5, %v3336_v9, %v2631_v6  ;;  %v281_v18 = vsel %vm280_vm5, %v3342_v11, %v2630_v7  ;;  %v2510_v6 = vpack.c.bf16 %v784_v5, %v783_v4  ;;  %v324_v7 = vlaneseq  ;;  %v685_v4 = vld [vmem:[%s4071_s5 + $0x88] sm:$0xff]  ;;  %v787_v5 = vld [vmem:[%s4072_s6 + $0x80] sm:$0xff] }
 0x139   :  { %v2634_v8 = vpop.permute.xlu0 %2633  ;;  %v2644_v16 = vpop.permute.xlu1 %2643 }
 0x13a   :  { %v2636_v14 = vunpack.i.h.bf16 %v2634_v8  ;;  %v2635_v15 = vunpack.i.l.bf16 %v2634_v8  ;;  %v2646_v19 = vunpack.i.h.bf16 %v2644_v16  ;;  %v2645_v20 = vunpack.i.l.bf16 %v2644_v16 }
 0x13b   :  { %v3457_v8 = vshrl.u32 %v324_v7, 7  ;;  %v788_v7 = vld [vmem:[%s4072_s6 + $0x88] sm:$0xff] }
 0x13c   :  { %v286_v21 = vsel %vm285_vm6, %v281_v18, %v2635_v15  ;;  %v287_v22 = vsel %vm285_vm6, %v282_v17, %v2636_v14  ;;  %v301_v24 = vpack.c.bf16 %v2646_v19, %v2645_v20 }
 0x13d   :  { %v2649_v23 = vpop.permute.xlu0 %2648  ;;  %v291_v25 = vsel %vm290_vm7, %v286_v21, %v2640_v13  ;;  %v292_v26 = vsel %vm290_vm7, %v287_v22, %v2641_v12  ;;  %v2654_v29 = vpop.permute.xlu1 %2653  ;;  %v326_v12 = vsub.s32 0, %v3457_v8  ;;  %v322_v13 = vld [vmem:[%s4098_s23] sm:$0x3]  ;;  %v330_v14 = vsub.s32 1, %v3457_v8 }
 0x13e   :  { %v2651_v27 = vunpack.i.h.bf16 %v2649_v23  ;;  %v2650_v28 = vunpack.i.l.bf16 %v2649_v23  ;;  %v296_v9 = vsel %vm295_vm8, %v291_v25, %v2645_v20  ;;  %v297_v11 = vsel %vm295_vm8, %v292_v26, %v2646_v19  ;;  %2247 = vmatprep.mubr.msk.bf16.mxu0 %vm422_vm9, %v301_v24  ;;  %v1508_v8 = vld [vmem:[%s4077_s11] sm:$0xff] }
 0x13f   :  { %v2656_v30 = vunpack.i.h.bf16 %v2654_v29  ;;  %v2655_v31 = vunpack.i.l.bf16 %v2654_v29  ;;  %v300_v32 = vpack.c.bf16 %v297_v11, %v296_v9  ;;  %v327_v15 = vrot.slane %v322_v13, %v326_v12 }
 0x140   :  { %v284_v33 = vsel %vm280_vm5, %v3368_v41, %v2651_v27  ;;  %v283_v34 = vsel %vm280_vm5, %v3339_v10, %v2650_v28  ;;  %v331_v17 = vrot.slane %v322_v13, %v330_v14  ;;  %v2516_v13 = vpack.c.bf16 %v788_v7, %v787_v5 }
 0x141   :  { %v288_v35 = vsel %vm285_vm6, %v283_v34, %v2655_v31  ;;  %v289_v36 = vsel %vm285_vm6, %v284_v33, %v2656_v30  ;;  %v2659_v37 = vpop.permute.xlu0 %2658  ;;  %468 = vmatmul.mubr.bf16.vlgmr.msra.gmra.mrb[0].mxu0 %v300_v32  ;;  %v2664_v40 = vpop.permute.xlu1 %2663  ;;  %vm1921_vm6 = vcmask 130048  }
 0x142   :  { %v2661_v38 = vunpack.i.h.bf16 %v2659_v37  ;;  %v2660_v39 = vunpack.i.l.bf16 %v2659_v37  ;;  %v2666_v42 = vunpack.i.h.bf16 %v2664_v40  ;;  %v2665_v43 = vunpack.i.l.bf16 %v2664_v40  ;;  %2493 = vmatpush1.bf16.msra.mxu0 %v2492_v52  ;;  %v668_v37 = vld [vmem:[%s4071_s5] sm:$0xff] }
 0x143   :  { %2494 = vmatprep.subr.bf16.mxu0 %v3091_v50  ;;  %v676_v52 = vld [vmem:[%s4071_s5 + $0x40] sm:$0xff] }
 0x144   :  { %v293_v44 = vsel %vm290_vm7, %v288_v35, %v2660_v39  ;;  %v294_v45 = vsel %vm290_vm7, %v289_v36, %v2661_v38  ;;  %v303_v46 = vpack.c.bf16 %v2666_v42, %v2665_v43  ;;  %v488_v35 = vld [vmem:[#allocation7] sm:$0xff]  ;;  %v489_v36 = vld [vmem:[#allocation7 + $0x8] sm:$0x3f]  ;;  %v669_v38 = vld [vmem:[%s4071_s5 + $0x8] sm:$0xff]  ;;  %v2474_v54 = vpack.c.bf16 %v677_v53, %v676_v52 }
 0x145   :  { %v298_v41 = vsel %vm295_vm8, %v293_v44, %v2665_v43  ;;  %v299_v10 = vsel %vm295_vm8, %v294_v45, %v2666_v42  ;;  %v579_v39 = vld [vmem:[#allocation8] sm:$0xff]  ;;  %v2462_v40 = vpack.c.bf16 %v669_v38, %v668_v37  ;;  %v670_v42 = vld [vmem:[%s4071_s5 + $0x10] sm:$0xff]  ;;  %v671_v43 = vld [vmem:[%s4071_s5 + $0x18] sm:$0xff] }
 0x146   :  { %v302_v47 = vpack.c.bf16 %v299_v10, %v298_v41  ;;  %2248 = vmatprep.mubr.msk.bf16.mxu0 %vm422_vm9, %v303_v46  ;;  %2496 = vmatpush1.bf16.msra.mxu0 %v2495_v55  ;;  %v580_v44 = vld [vmem:[#allocation8 + $0x8] sm:$0x3f]  ;;  %v2465_v45 = vpack.c.bf16 %v671_v43, %v670_v42  ;;  %v672_v46 = vld [vmem:[%s4071_s5 + $0x20] sm:$0xff]  ;;  %v678_v55 = vld [vmem:[%s4071_s5 + $0x50] sm:$0xff] }
 0x147   :  { %2497 = vmatprep.subr.bf16.mxu0 %v3091_v50  ;;  %v673_v41 = vld [vmem:[%s4071_s5 + $0x28] sm:$0xff]  ;;  %v2477_v57 = vpack.c.bf16 %v679_v56, %v678_v55  ;;  %v2743_v52 = vld [vmem:[%s4073_s7 + $0x94] ss:$8 sps:$4 sm:$0xff]   ;;  %v2741_v53 = vld [vmem:[%s4073_s7 + $0x90] ss:$8 sps:$4 sm:$0xff]  }
 0x148   :  { %v2468_v10 = vpack.c.bf16 %v673_v41, %v672_v46  ;;  %v2722_v37 = vld [vmem:[%s4073_s7 + $0x24] ss:$8 sps:$4 sm:$0xff]   ;;  %v2720_v38 = vld [vmem:[%s4073_s7 + $0x20] ss:$8 sps:$4 sm:$0xff]   ;;  %v2749_v56 = vld [vmem:[%s4073_s7 + $0xb4] ss:$8 sps:$4 sm:$0xff]  }
 0x149   :  { %478 = vmatmul.mubr.bf16.gmra.mrb[4].mxu0 %v302_v47  ;;  %v674_v47 = vld [vmem:[%s4071_s5 + $0x30] sm:$0xff]  ;;  %v2728_v42 = vld [vmem:[%s4073_s7 + $0x44] ss:$8 sps:$4 sm:$0xff]   ;;  %v2726_v43 = vld [vmem:[%s4073_s7 + $0x40] ss:$8 sps:$4 sm:$0xff]  }
 0x14a   :  { %2499 = vmatpush1.bf16.msra.mxu0 %v2498_v58  ;;  %v2471_v51 = vpack.c.bf16 %v675_v49, %v674_v47  ;;  %v680_v58 = vld [vmem:[%s4071_s5 + $0x60] sm:$0xff]  ;;  %v2735_v47 = vld [vmem:[%s4073_s7 + $0x70] ss:$8 sps:$4 sm:$0xff]  }
 0x14b   :  { %2500 = vmatprep.subr.bf16.mxu0 %v3091_v50  ;;  %v2480_v60 = vpack.c.bf16 %v681_v59, %v680_v58  ;;  %v2734_v46 = vld [vmem:[%s4073_s7 + $0x64] ss:$8 sps:$4 sm:$0xff]   ;;  %v2732_v41 = vld [vmem:[%s4073_s7 + $0x60] ss:$8 sps:$4 sm:$0xff]  }
 0x14c   :  { %v2740_v49 = vld [vmem:[%s4073_s7 + $0x84] ss:$8 sps:$4 sm:$0xff]   ;;  %v2744_v55 = vld [vmem:[%s4073_s7 + $0xa0] ss:$8 sps:$4 sm:$0xff]  }
 0x14d   :  { %v2752_v58 = vld [vmem:[%s4073_s7 + $0xc4] ss:$8 sps:$4 sm:$0xff]   ;;  %v2750_v59 = vld [vmem:[%s4073_s7 + $0xc0] ss:$8 sps:$4 sm:$0xff]  }
 0x14e   :  { %2502 = vmatpush1.bf16.msra.mxu0 %v2501_v61  ;;  %v682_v61 = vld [vmem:[%s4071_s5 + $0x70] sm:$0xff] }
 0x14f   :  { %2503 = vmatprep.subr.bf16.mxu0 %v3091_v50 }
 0x152   :  { %2505 = vmatpush1.bf16.msra.mxu0 %v2504_v0  ;;  %v2483_v0 = vpack.c.bf16 %v683_v62, %v682_v61  ;;  %v2753_v61 = vld [vmem:[%s4073_s7 + $0xd0] ss:$8 sps:$4 sm:$0xff]  }
 0x153   :  { %2506 = vmatprep.subr.bf16.mxu0 %v3091_v50 }
 0x156   :  { %2508 = vmatpush1.bf16.msra.mxu0 %v2507_v3  ;;  %v684_v3 = vld [vmem:[%s4071_s5 + $0x80] sm:$0xff] }
 0x157   :  { %2509 = vmatprep.subr.bf16.mxu0 %v3091_v50 }
 0x15a   :  { %2511 = vmatpush1.bf16.msra.mxu0 %v2510_v6  ;;  %v2486_v6 = vpack.c.bf16 %v685_v4, %v684_v3 }
 0x15b   :  { %2512 = vmatprep.subr.bf16.mxu0 %v3091_v50 }
 0x15e   :  { %2514 = vmatpush1.bf16.msra.mxu0 %v2513_v2 }
 0x15f   :  { %2515 = vmatprep.subr.bf16.mxu0 %v3091_v50 }
 0x162   :  { %2517 = vmatpush1.bf16.msra.mxu0 %v2516_v13  ;;  %v2758_v13 = vld [vmem:[%s4073_s7 + $0xe4] ss:$8 sps:$4 sm:$0xff]  }
 0x163   :  { %2518 = vmatprep.subr.bf16.mxu0 %v3091_v50 }
 0x214   :  { %v469_v16 = vpop.f32.mrb[0].mxu0 }
 0x215   :  { %v471_v18 = vpop.f32.mrb[1].mxu0  ;;  %v470_v20 = vadd.f32 %v469_v16, %v327_v15  ;;  %v687_v16 = vld [vmem:[%s4071_s5 + $0x98] sm:$0xff] }
 0x216   :  { %v473_v19 = vpop.f32.mrb[2].mxu0  ;;  %v472_v23 = vadd.f32 %v471_v18, %v331_v17 }
 0x217   :  { %v474_v21 = vadd.f32 %v473_v19, %v327_v15  ;;  %v475_v22 = vpop.f32.mrb[3].mxu0  ;;  %v790_v19 = vld [vmem:[%s4072_s6 + $0x98] sm:$0xff] }
 0x218   :  { %v476_v24 = vadd.f32 %v475_v22, %v331_v17  ;;  %v791_v22 = vld [vmem:[%s4072_s6 + $0xa0] sm:$0xff] }
 0x219   :  { %v2443_v25 = vpack.c.bf16 %v474_v21, %v470_v20  ;;  %v688_v21 = vld [vmem:[%s4071_s5 + $0xa0] sm:$0xff] }
 0x21a   :  { %v2441_v26 = vpack.c.bf16 %v476_v24, %v472_v23 }
 0x21c   :  { %v479_v27 = vpop.f32.mrb[4].mxu0  ;;  %2442 = vmatprep.subr.bf16.mxu1 %v2441_v26 }
 0x21d   :  { %v481_v28 = vpop.f32.mrb[5].mxu0  ;;  %2444 = vmatpush1.bf16.msra.mxu1 %v2443_v25  ;;  %v480_v9 = vadd.f32 %v479_v27, %v327_v15 }
 0x21e   :  { %v483_v29 = vpop.f32.mrb[6].mxu0  ;;  %v482_v31 = vadd.f32 %v481_v28, %v331_v17 }
 0x21f   :  { %v484_v11 = vadd.f32 %v483_v29, %v327_v15  ;;  %v485_v30 = vpop.f32.mrb[7].mxu0  ;;  %v686_v15 = vld [vmem:[%s4071_s5 + $0x90] sm:$0xff]  ;;  %s3093_s5 = smov 40  }
 0x220   :  { %v486_v32 = vadd.f32 %v485_v30, %v331_v17  ;;  %v789_v17 = vld [vmem:[%s4072_s6 + $0x90] sm:$0xff]  ;;  %v2489_v18 = vpack.c.bf16 %v687_v16, %v686_v15  ;;  %v2756_v15 = vld [vmem:[%s4073_s7 + $0xe0] ss:$8 sps:$4 sm:$0xff]   ;;  %s3094_s6 = smov 80  }
 0x221   :  { %v2448_v33 = vpack.c.bf16 %v484_v11, %v480_v9  ;;  %v2519_v20 = vpack.c.bf16 %v790_v19, %v789_v17  ;;  %v2761_v16 = vld [vmem:[%s4073_s7 + $0xf4] ss:$8 sps:$4 sm:$0xff]  }
 0x222   :  { %v2445_v34 = vpack.c.bf16 %v486_v32, %v482_v31 }
 0x223   :  { %2520 = vmatpush1.bf16.msra.mxu0 %v2519_v20 }
 0x224   :  { %2447 = vmatprep.subr.msk.bf16.mxu1 %vm2446_vm11, %v2445_v34  ;;  %832 = vmatprep.subr.mxu0 %v3090_v48 }
 0x225   :  { %2450 = vmatpush1.bf16.msk.msra.mxu1 %vm2446_vm11, %v2448_v33 }
 0x226   :  { %2452 = vmatprep.subr.bf16.mxu1 %v2441_v26 }
 0x227   :  { %833 = vmatpush1.msra.mxu0 %v791_v22 }
 0x228   :  { %2251 = vmatmul.mubr.msk.f32.vlgmr.msra.gmra.mrb[0].mxu1 %vm280_vm5, %v488_v35  ;;  %v2719_v35 = vld [vmem:[%s4073_s7 + $0x14] ss:$8 sps:$4 sm:$0xff]  }
 0x229   :  { %2454 = vmatpush1.bf16.msra.mxu1 %v2443_v25  ;;  %572 = vmatprep.mubr.f32.mxu1 %v3090_v48 }
 0x22a   :  { %2457 = vmatprep.subr.msk.bf16.mxu1 %vm2446_vm11, %v2445_v34  ;;  %v2716_v34 = vld [vmem:[%s4073_s7 + $0x4] ss:$8 sps:$4 sm:$0xff]  }
 0x22c   :  { %2252 = vmatmul.mubr.msk.f32.gmra.mrb[2].mxu1 %vm280_vm5, %v489_v36  ;;  %v2717_v36 = vld [vmem:[%s4073_s7 + $0x10] ss:$8 sps:$4 sm:$0xff]  }
 0x22d   :  { %2460 = vmatpush1.bf16.msk.msra.mxu1 %vm2446_vm11, %v2448_v33  ;;  %651 = vmatprep.mubr.f32.mxu1 %v3090_v48  ;;  %v2714_v33 = vld [vmem:[%s4073_s7] ss:$8 sps:$4 sm:$0xff]  }
 0x22e   :  { %2461 = vmatprep.subr.bf16.mxu1 %v3091_v50 }
 0x230   :  { %2255 = vmatmul.mubr.msk.f32.vlgmr.msra.gmra.mrb[4].mxu1 %vm280_vm5, %v579_v39  ;;  %v2725_v39 = vld [vmem:[%s4073_s7 + $0x34] ss:$8 sps:$4 sm:$0xff]  }
 0x231   :  { %657 = vmatprep.mubr.f32.mxu1 %v3090_v48  ;;  %2463 = vmatpush1.bf16.msra.mxu1 %v2462_v40  ;;  %v2723_v40 = vld [vmem:[%s4073_s7 + $0x30] ss:$8 sps:$4 sm:$0xff]  }
 0x232   :  { %2464 = vmatprep.subr.bf16.mxu1 %v3091_v50 }
 0x234   :  { %2256 = vmatmul.mubr.msk.f32.gmra.mrb[6].mxu1 %vm280_vm5, %v580_v44  ;;  %v2731_v44 = vld [vmem:[%s4073_s7 + $0x54] ss:$8 sps:$4 sm:$0xff]   ;;  %vm1714_vm5 = vcmask 523264  }
 0x235   :  { %2466 = vmatpush1.bf16.msra.mxu1 %v2465_v45  ;;  %v2729_v45 = vld [vmem:[%s4073_s7 + $0x50] ss:$8 sps:$4 sm:$0xff]  }
 0x236   :  { %2467 = vmatprep.subr.bf16.mxu1 %v3091_v50 }
 0x239   :  { %2469 = vmatpush1.bf16.msra.mxu1 %v2468_v10  ;;  %v2737_v10 = vld [vmem:[%s4073_s7 + $0x74] ss:$8 sps:$4 sm:$0xff]  }
 0x23a   :  { %2470 = vmatprep.subr.bf16.mxu1 %v3091_v50 }
 0x23d   :  { %2472 = vmatpush1.bf16.msra.mxu1 %v2471_v51  ;;  %v2738_v51 = vld [vmem:[%s4073_s7 + $0x80] ss:$8 sps:$4 sm:$0xff]  }
 0x23e   :  { %2473 = vmatprep.subr.bf16.mxu1 %v3091_v50 }
 0x241   :  { %2475 = vmatpush1.bf16.msra.mxu1 %v2474_v54  ;;  %v2746_v54 = vld [vmem:[%s4073_s7 + $0xa4] ss:$8 sps:$4 sm:$0xff]  }
 0x242   :  { %2476 = vmatprep.subr.bf16.mxu1 %v3091_v50 }
 0x245   :  { %2478 = vmatpush1.bf16.msra.mxu1 %v2477_v57  ;;  %v2747_v57 = vld [vmem:[%s4073_s7 + $0xb0] ss:$8 sps:$4 sm:$0xff]  }
 0x246   :  { %2479 = vmatprep.subr.bf16.mxu1 %v3091_v50 }
 0x249   :  { %2481 = vmatpush1.bf16.msra.mxu1 %v2480_v60  ;;  %v2755_v60 = vld [vmem:[%s4073_s7 + $0xd4] ss:$8 sps:$4 sm:$0xff]  }
 0x24a   :  { %2482 = vmatprep.subr.bf16.mxu1 %v3091_v50 }
 0x24d   :  { %2484 = vmatpush1.bf16.msra.mxu1 %v2483_v0 }
 0x24e   :  { %2485 = vmatprep.subr.bf16.mxu1 %v3091_v50 }
 0x251   :  { %2487 = vmatpush1.bf16.msra.mxu1 %v2486_v6 }
 0x252   :  { %2488 = vmatprep.subr.bf16.mxu1 %v3091_v50 }
 0x255   :  { %2490 = vmatpush1.bf16.msra.mxu1 %v2489_v18  ;;  %v2759_v18 = vld [vmem:[%s4073_s7 + $0xf0] ss:$8 sps:$4 sm:$0xff]  }
 0x256   :  { %736 = vmatprep.subr.mxu1 %v3090_v48 }
 0x259   :  { %737 = vmatpush1.msra.mxu1 %v688_v21 }
 0x25a   :  { %1263 = vmatprep.subr.bf16.mxu1 %v2716_v34 }
 0x2fb   :  { %v568_v23 = vpop.f32.mrb[0].mxu1 }
 0x2fc   :  { %v570_v24 = vpop.f32.mrb[1].mxu1 }
 0x2ff   :  { %v574_v25 = vpop.f32.mrb[2].mxu1 }
 0x300   :  { %v576_v26 = vpop.f32.mrb[3].mxu1 }
 0x303   :  { %v653_v27 = vpop.f32.mrb[4].mxu1 }
 0x304   :  { %v664_v28 = vmax.f32 %v568_v23, %v653_v27  ;;  %v655_v29 = vpop.f32.mrb[5].mxu1 }
 0x305   :  { %v665_v9 = vmax.f32 %v570_v24, %v655_v29 }
 0x307   :  { %v659_v11 = vpop.f32.mrb[6].mxu1  ;;  %2257 = vmatprep.mubr.msk.f32.mxu1 %vm689_vm12, %v665_v9  ;;  %2259 = vmatprep.mubr.msk.f32.mxu0 %vm689_vm12, %v665_v9 }
 0x308   :  { %v666_v30 = vmax.f32 %v574_v25, %v659_v11  ;;  %v661_v31 = vpop.f32.mrb[7].mxu1  ;;  %761 = vmatmul.mubr.f32.vlgmr.msra.gmra.mrb[8].mxu1 %v664_v28  ;;  %857 = vmatmul.mubr.f32.vlgmr.msra.gmra.mrb[8].mxu0 %v664_v28 }
 0x309   :  { %v667_v32 = vmax.f32 %v576_v26, %v661_v31  ;;  %1264 = vmatpush1.bf16.msra.mxu1 %v2714_v33  ;;  %v2764_v26 = vld [vmem:[%s4073_s7 + $0x104] ss:$8 sps:$4 sm:$0xff]  }
 0x30a   :  { %1265 = vmatprep.subr.bf16.mxu1 %v2719_v35 }
 0x30b   :  { %2258 = vmatprep.mubr.msk.f32.mxu1 %vm689_vm12, %v667_v32  ;;  %2260 = vmatprep.mubr.msk.f32.mxu0 %vm689_vm12, %v667_v32 }
 0x30c   :  { %766 = vmatmul.mubr.f32.gmra.mrb[10].mxu1 %v666_v30  ;;  %862 = vmatmul.mubr.f32.gmra.mrb[10].mxu0 %v666_v30 }
 0x30d   :  { %1424 = vmatprep.mubr.f32.mxu0 %v3090_v48  ;;  %1266 = vmatpush1.bf16.msra.mxu1 %v2717_v36 }
 0x30e   :  { %1267 = vmatprep.subr.bf16.mxu1 %v2722_v37 }
 0x311   :  { %1268 = vmatpush1.bf16.msra.mxu1 %v2720_v38 }
 0x312   :  { %1269 = vmatprep.subr.bf16.mxu1 %v2725_v39 }
 0x315   :  { %1270 = vmatpush1.bf16.msra.mxu1 %v2723_v40 }
 0x316   :  { %1271 = vmatprep.subr.bf16.mxu1 %v2728_v42 }
 0x319   :  { %1272 = vmatpush1.bf16.msra.mxu1 %v2726_v43 }
 0x31a   :  { %1273 = vmatprep.subr.bf16.mxu1 %v2731_v44 }
 0x31d   :  { %1274 = vmatpush1.bf16.msra.mxu1 %v2729_v45 }
 0x31e   :  { %1275 = vmatprep.subr.bf16.mxu1 %v2734_v46 }
 0x321   :  { %1276 = vmatpush1.bf16.msra.mxu1 %v2732_v41 }
 0x322   :  { %1277 = vmatprep.subr.bf16.mxu1 %v2737_v10 }
 0x325   :  { %1278 = vmatpush1.bf16.msra.mxu1 %v2735_v47 }
 0x326   :  { %1279 = vmatprep.subr.bf16.mxu1 %v2740_v49 }
 0x329   :  { %1280 = vmatpush1.bf16.msra.mxu1 %v2738_v51 }
 0x32a   :  { %1281 = vmatprep.subr.bf16.mxu1 %v2743_v52 }
 0x32d   :  { %1282 = vmatpush1.bf16.msra.mxu1 %v2741_v53 }
 0x32e   :  { %1283 = vmatprep.subr.bf16.mxu1 %v2746_v54 }
 0x331   :  { %1284 = vmatpush1.bf16.msra.mxu1 %v2744_v55  ;;  %v2762_v55 = vld [vmem:[%s4073_s7 + $0x100] ss:$8 sps:$4 sm:$0xff]  }
 0x332   :  { %1285 = vmatprep.subr.bf16.mxu1 %v2749_v56 }
 0x335   :  { %1286 = vmatpush1.bf16.msra.mxu1 %v2747_v57  ;;  %v2767_v57 = vld [vmem:[%s4073_s7 + $0x114] ss:$8 sps:$4 sm:$0xff]  }
 0x336   :  { %1287 = vmatprep.subr.bf16.mxu1 %v2752_v58 }
 0x339   :  { %1288 = vmatpush1.bf16.msra.mxu1 %v2750_v59  ;;  %v2765_v59 = vld [vmem:[%s4073_s7 + $0x110] ss:$8 sps:$4 sm:$0xff]  }
 0x33a   :  { %1289 = vmatprep.subr.bf16.mxu1 %v2755_v60  ;;  %v2770_v60 = vld [vmem:[%s4073_s7 + $0x124] ss:$8 sps:$4 sm:$0xff]  }
 0x33d   :  { %1290 = vmatpush1.bf16.msra.mxu1 %v2753_v61  ;;  %v2768_v61 = vld [vmem:[%s4073_s7 + $0x120] ss:$8 sps:$4 sm:$0xff]  }
 0x33e   :  { %1291 = vmatprep.subr.bf16.mxu1 %v2758_v13  ;;  %v2788_v13 = vld [vmem:[%s4073_s7 + $0x184] ss:$8 sps:$4 sm:$0xff]  }
 0x341   :  { %1292 = vmatpush1.bf16.msra.mxu1 %v2756_v15  ;;  %v2786_v15 = vld [vmem:[%s4073_s7 + $0x180] ss:$8 sps:$4 sm:$0xff]  }
 0x342   :  { %1293 = vmatprep.subr.bf16.mxu1 %v2761_v16  ;;  %v2791_v16 = vld [vmem:[%s4073_s7 + $0x194] ss:$8 sps:$4 sm:$0xff]  }
 0x345   :  { %1294 = vmatpush1.bf16.msra.mxu1 %v2759_v18  ;;  %v2789_v18 = vld [vmem:[%s4073_s7 + $0x190] ss:$8 sps:$4 sm:$0xff]  }
 0x346   :  { %1306 = vmatprep.subr.bf16.mxu1 %v2764_v26 }
 0x3db   :  { %v762_v62 = vpop.f32.mrb[8].mxu1  ;;  %v858_v63 = vpop.f32.mrb[8].mxu0 }
 0x3dc   :  { %v867_v0 = vmax.f32 %v762_v62, %v858_v63  ;;  %v764_v1 = vpop.f32.mrb[9].mxu1  ;;  %v860_v2 = vpop.f32.mrb[9].mxu0  ;;  %v2773_v62 = vld [vmem:[%s4073_s7 + $0x134] ss:$8 sps:$4 sm:$0xff]   ;;  %v2771_v63 = vld [vmem:[%s4073_s7 + $0x130] ss:$8 sps:$4 sm:$0xff]  }
 0x3dd   :  { %v2774_v1 = vld [vmem:[%s4073_s7 + $0x140] ss:$8 sps:$4 sm:$0xff]   ;;  %v2779_v2 = vld [vmem:[%s4073_s7 + $0x154] ss:$8 sps:$4 sm:$0xff]  }
 0x3de   :  { %2833 = vtanh.f32 %v867_v0  ;;  %v2776_v0 = vld [vmem:[%s4073_s7 + $0x144] ss:$8 sps:$4 sm:$0xff]  }
 0x3df   :  { %v767_v3 = vpop.f32.mrb[10].mxu1  ;;  %v863_v4 = vpop.f32.mrb[10].mxu0 }
 0x3e0   :  { %v868_v5 = vmax.f32 %v767_v3, %v863_v4  ;;  %v769_v6 = vpop.f32.mrb[11].mxu1  ;;  %v865_v7 = vpop.f32.mrb[11].mxu0  ;;  %v2777_v3 = vld [vmem:[%s4073_s7 + $0x150] ss:$8 sps:$4 sm:$0xff]   ;;  %v2782_v4 = vld [vmem:[%s4073_s7 + $0x164] ss:$8 sps:$4 sm:$0xff]  }
 0x3e1   :  { %v2785_v6 = vld [vmem:[%s4073_s7 + $0x174] ss:$8 sps:$4 sm:$0xff]   ;;  %v2783_v7 = vld [vmem:[%s4073_s7 + $0x170] ss:$8 sps:$4 sm:$0xff]  }
 0x3e2   :  { %2835 = vtanh.f32 %v868_v5  ;;  %v2780_v5 = vld [vmem:[%s4073_s7 + $0x160] ss:$8 sps:$4 sm:$0xff]  }
 0x3e8   :  { %v2834_v17 = vpop.eup %2833 }
 0x3e9   :  { %v882_v20 = vrot.slane %v2834_v17, 2  ;;  %v873_v21 = vrot.slane %v2834_v17, 1  ;;  %v900_v29 = vrot.slane %v2834_v17, 4  ;;  %v891_v9 = vrot.slane %v2834_v17, 3 }
 0x3ec   :  { %v2836_v19 = vpop.eup %2835 }
 0x3ed   :  { %v883_v22 = vrot.slane %v2836_v19, 2  ;;  %v874_v23 = vrot.slane %v2836_v19, 1  ;;  %v901_v24 = vrot.slane %v2836_v19, 4  ;;  %v892_v25 = vrot.slane %v2836_v19, 3 }
 0x3ef   :  { %v884_v27 = vsel %vm197_vm3, %v882_v20, %v883_v22  ;;  %v875_v28 = vsel %vm201_vm1, %v873_v21, %v874_v23  ;;  %v902_v31 = vsel %vm260_vm4, %v900_v29, %v901_v24  ;;  %v893_v32 = vsel %vm240_vm2, %v891_v9, %v892_v25  ;;  %vm2522_vm1 = vmpackc.low %vm184_vm0, %vm3092_vm10 }
 0x3f0   :  { %v2672_v11 = vpack.i.bf16 %v883_v22, %v884_v27  ;;  %v2667_v30 = vpack.i.bf16 %v874_v23, %v875_v28  ;;  %v2682_v33 = vpack.i.bf16 %v901_v24, %v902_v31  ;;  %v2677_v34 = vpack.i.bf16 %v892_v25, %v893_v32  ;;  %v976_v25 = vld [vmem:[#allocation10] sm:$0x3] }
 0x3f1   :  { %v981_v26 = vrot.slane %v976_v25, %v326_v12  ;;  %v985_v28 = vrot.slane %v976_v25, %v330_v14  ;;  %vm1350_vm2 = vcmask 80896   ;;  %v1509_v12 = vld [vmem:[%s4077_s11 + $0x8] sm:$0xff]  ;;  %v1431_v14 = vld [vmem:[#allocation13] sm:$0x1f]  ;;  %vm1528_vm3 = vcmask 261120  }
 0x3f2   :  { %2673 = vrot.lane.b32.xlu1 %v2672_v11, %s3093_s5  ;;  %2668 = vrot.lane.b32.xlu0 %v2667_v30, %s3087_s24 }
 0x3f6   :  { %2683 = vrot.lane.b32.xlu1 %v2682_v33, %s3094_s6  ;;  %2678 = vrot.lane.b32.xlu0 %v2677_v34, %s3095_s21 }
 0x464   :  { %v2674_v35 = vpop.permute.xlu1 %2673  ;;  %v2669_v36 = vpop.permute.xlu0 %2668 }
 0x465   :  { %v2676_v37 = vunpack.i.h.bf16 %v2674_v35  ;;  %v2675_v38 = vunpack.i.l.bf16 %v2674_v35  ;;  %v2671_v39 = vunpack.i.h.bf16 %v2669_v36  ;;  %v2670_v40 = vunpack.i.l.bf16 %v2669_v36  ;;  %v1349_v36 = vld [vmem:[#allocation11] sm:$0x1f] }
 0x467   :  { %v910_v46 = vsel %vm290_vm7, %v2836_v19, %v2671_v39  ;;  %v912_v41 = vsel %vm689_vm12, %v2671_v39, %v2676_v37  ;;  %v911_v10 = vsel %vm689_vm12, %v2670_v40, %v2675_v38  ;;  %v909_v47 = vsel %vm290_vm7, %v2834_v17, %v2670_v40  ;;  %v975_v17 = vld [vmem:[%s4073_s7 + $0x1a0] sm:$0x33]  ;;  %v1510_v38 = vld [vmem:[%s4077_s11 + $0x10] sm:$0xff]  ;;  %v1511_v39 = vld [vmem:[%s4077_s11 + $0x18] sm:$0xff] }
 0x468   :  { %v3685_v42 = vpop.permute.xlu1 %2683  ;;  %v3687_v43 = vpop.permute.xlu0 %2678  ;;  %v919_v56 = vpack.c.bf16 %v910_v46, %v909_v47  ;;  %v2314_v19 = vcombine.high %v975_v17, %v975_v17  ;;  %v2313_v20 = vcombine.low %v975_v17, %v975_v17  ;;  %v2534_v37 = vpack.c.bf16 %v1509_v12, %v1508_v8  ;;  %v1515_v46 = vld [vmem:[%s4077_s11 + $0x38] sm:$0xff]  ;;  %v1517_v47 = vld [vmem:[%s4077_s11 + $0x48] sm:$0xff]  ;;  %v1604_v17 = vld [vmem:[%s4078_s12 + $0x10] sm:$0xff] }
 0x469   :  { %v2681_v44 = vunpack.i.h.bf16 %v3687_v43  ;;  %v2680_v45 = vunpack.i.l.bf16 %v3687_v43  ;;  %v2686_v49 = vunpack.i.h.bf16 %v3685_v42  ;;  %v2685_v51 = vunpack.i.l.bf16 %v3685_v42  ;;  %v1512_v42 = vld [vmem:[%s4077_s11 + $0x20] sm:$0xff]  ;;  %v1513_v43 = vld [vmem:[%s4077_s11 + $0x28] sm:$0xff] }
 0x46a   :  { %v1258_v21 = vsel %vm184_vm0, %v2313_v20, 0  ;;  %v2537_v40 = vpack.c.bf16 %v1511_v39, %v1510_v38  ;;  %v1606_v20 = vld [vmem:[%s4078_s12 + $0x20] sm:$0xff]  ;;  %v1619_v8 = vld [vmem:[%s4078_s12 + $0x88] sm:$0xff] }
 0x46b   :  { %v914_v52 = vsel %vm913_vm13, %v911_v10, %v2680_v45  ;;  %v915_v53 = vsel %vm913_vm13, %v912_v41, %v2681_v44  ;;  %v922_v58 = vpack.c.bf16 %v2686_v49, %v2685_v51  ;;  %v918_v22 = vsel %vm916_vm15, %v2681_v44, %v2686_v49  ;;  %v1516_v10 = vld [vmem:[%s4077_s11 + $0x40] sm:$0xff] }
 0x46c   :  { %v920_v54 = vpack.c.bf16 %v915_v53, %v914_v52  ;;  %v917_v23 = vsel %vm916_vm15, %v2680_v45, %v2685_v51  ;;  %v2540_v44 = vpack.c.bf16 %v1513_v43, %v1512_v42  ;;  %v1514_v45 = vld [vmem:[%s4077_s11 + $0x30] sm:$0xff]  ;;  %v2546_v49 = vpack.c.bf16 %v1517_v47, %v1516_v10  ;;  %v1519_v52 = vld [vmem:[%s4077_s11 + $0x58] sm:$0xff]  ;;  %v2794_v39 = vld [vmem:[%s4079_s13 + $0x80] sm:$0xff]  }
 0x46d   :  { %v921_v24 = vpack.c.bf16 %v918_v22, %v917_v23  ;;  %v2543_v41 = vpack.c.bf16 %v1515_v46, %v1514_v45  ;;  %v1518_v51 = vld [vmem:[%s4077_s11 + $0x50] sm:$0xff]  ;;  %v3096_v42 = vmov 0   ;;  %v2797_v43 = vld [vmem:[%s4079_s13] sm:$0xff]   ;;  %v2800_v45 = vld [vmem:[%s4079_s13 + $0x8] sm:$0xff]  }
 0x46e   :  { %1295 = vmatprep.mubr.bf16.mxu1 %v920_v54  ;;  %v2549_v53 = vpack.c.bf16 %v1519_v52, %v1518_v51  ;;  %v1520_v54 = vld [vmem:[%s4077_s11 + $0x60] sm:$0xff]  ;;  %v1608_v23 = vld [vmem:[%s4078_s12 + $0x30] sm:$0xff]  ;;  %v2804_v47 = vld [vmem:[%s4079_s13 + $0x58] sm:$0xff]  }
 0x46f   :  { %1296 = vmatmul.mubr.bf16.vlgmr.msra.gmra.mrb[12].mxu1 %v919_v56  ;;  %v2801_v46 = vld [vmem:[%s4079_s13 + $0x50] sm:$0xff]   ;;  %v2806_v51 = vld [vmem:[%s4079_s13 + $0x18] sm:$0xff]   ;;  %v2807_v52 = vld [vmem:[%s4079_s13 + $0x60] sm:$0xff]  }
 0x470   :  { %1307 = vmatpush1.bf16.msra.mxu1 %v2762_v55  ;;  %2316 = vmatprep.mubr.msk.bf16.mxu1 %vm1253_vm14, %v922_v58  ;;  %v1521_v55 = vld [vmem:[%s4077_s11 + $0x68] sm:$0xff]  ;;  %v1523_v58 = vld [vmem:[%s4077_s11 + $0x78] sm:$0xff]  ;;  %v2803_v10 = vld [vmem:[%s4079_s13 + $0x10] sm:$0xff]  }
 0x471   :  { %1308 = vmatprep.subr.bf16.mxu1 %v2767_v57  ;;  %v2552_v56 = vpack.c.bf16 %v1521_v55, %v1520_v54  ;;  %v1522_v57 = vld [vmem:[%s4077_s11 + $0x70] sm:$0xff]  ;;  %v2809_v54 = vld [vmem:[%s4079_s13 + $0x20] sm:$0xff]   ;;  %v2810_v55 = vld [vmem:[%s4079_s13 + $0x68] sm:$0xff]  }
 0x474   :  { %1309 = vmatpush1.bf16.msra.mxu1 %v2765_v59  ;;  %v2555_v59 = vpack.c.bf16 %v1523_v58, %v1522_v57  ;;  %v2812_v57 = vld [vmem:[%s4079_s13 + $0x28] sm:$0xff]   ;;  %v2811_v58 = vld [vmem:[%s4079_s13 + $0xb0] sm:$0xff]  }
 0x475   :  { %1310 = vmatprep.subr.bf16.mxu1 %v2770_v60  ;;  %v1524_v60 = vld [vmem:[%s4077_s11 + $0x80] sm:$0xff] }
 0x478   :  { %1311 = vmatpush1.bf16.msra.mxu1 %v2768_v61  ;;  %v1525_v61 = vld [vmem:[%s4077_s11 + $0x88] sm:$0xff] }
 0x479   :  { %1312 = vmatprep.subr.bf16.mxu1 %v2773_v62  ;;  %v2558_v62 = vpack.c.bf16 %v1525_v61, %v1524_v60 }
 0x47c   :  { %1313 = vmatpush1.bf16.msra.mxu1 %v2771_v63  ;;  %v1526_v63 = vld [vmem:[%s4077_s11 + $0x90] sm:$0xff] }
 0x47d   :  { %1314 = vmatprep.subr.bf16.mxu1 %v2776_v0  ;;  %v1527_v0 = vld [vmem:[%s4077_s11 + $0x98] sm:$0xff] }
 0x480   :  { %1315 = vmatpush1.bf16.msra.mxu1 %v2774_v1  ;;  %v2561_v1 = vpack.c.bf16 %v1527_v0, %v1526_v63  ;;  %v2813_v0 = vld [vmem:[%s4079_s13 + $0x70] sm:$0xff]  }
 0x481   :  { %1316 = vmatprep.subr.bf16.mxu1 %v2779_v2 }
 0x484   :  { %1317 = vmatpush1.bf16.msra.mxu1 %v2777_v3 }
 0x485   :  { %1318 = vmatprep.subr.bf16.mxu1 %v2782_v4  ;;  %v1602_v4 = vld [vmem:[%s4078_s12] sm:$0xff] }
 0x488   :  { %1319 = vmatpush1.bf16.msra.mxu1 %v2780_v5  ;;  %v1603_v5 = vld [vmem:[%s4078_s12 + $0x8] sm:$0xff] }
 0x489   :  { %1320 = vmatprep.subr.bf16.mxu1 %v2785_v6 }
 0x48c   :  { %1321 = vmatpush1.bf16.msra.mxu1 %v2783_v7 }
 0x48d   :  { %1322 = vmatprep.subr.bf16.mxu1 %v2788_v13 }
 0x490   :  { %1323 = vmatpush1.bf16.msra.mxu1 %v2786_v15 }
 0x491   :  { %1324 = vmatprep.subr.bf16.mxu1 %v2791_v16  ;;  %v2564_v16 = vpack.c.bf16 %v1603_v5, %v1602_v4  ;;  %v2817_v4 = vld [vmem:[%s4079_s13 + $0xc0] sm:$0xff]   ;;  %v2818_v5 = vld [vmem:[%s4079_s13 + $0x38] sm:$0xff]  }
 0x494   :  { %1325 = vmatpush1.bf16.msra.mxu1 %v2789_v18  ;;  %v1605_v18 = vld [vmem:[%s4078_s12 + $0x18] sm:$0xff] }
 0x495   :  { %2315 = vmatprep.subr.msk.bf16.mxu1 %vm184_vm0, %v2314_v19  ;;  %v2567_v19 = vpack.c.bf16 %v1605_v18, %v1604_v17 }
 0x498   :  { %1327 = vmatpush1.bf16.msra.mxu1 %v1258_v21  ;;  %v1607_v21 = vld [vmem:[%s4078_s12 + $0x28] sm:$0xff] }
 0x499   :  { %v2570_v22 = vpack.c.bf16 %v1607_v21, %v1606_v20 }
 0x49b   :  { %1339 = vmatmul.mubr.bf16.vlgmr.msra.gmra.mrb[12].mxu1 %v921_v24  ;;  %v1609_v24 = vld [vmem:[%s4078_s12 + $0x38] sm:$0xff] }
 0x49c   :  { %v2573_v25 = vpack.c.bf16 %v1609_v24, %v1608_v23 }
 0x56e   :  { %v1340_v27 = vpop.f32.mrb[12].mxu1 }
 0x56f   :  { %v1342_v29 = vpop.f32.mrb[13].mxu1  ;;  %v2593_v11 = vadd.f32 %v1340_v27, %v981_v26  ;;  %v1611_v27 = vld [vmem:[%s4078_s12 + $0x48] sm:$0xff] }
 0x570   :  { %v1344_v9 = vpop.f32.mrb[14].mxu1  ;;  %v2594_v32 = vadd.f32 %v1342_v29, %v985_v28  ;;  %v1612_v29 = vld [vmem:[%s4078_s12 + $0x50] sm:$0xff] }
 0x571   :  { %v2595_v30 = vadd.f32 %v1344_v9, %v981_v26  ;;  %v1346_v31 = vpop.f32.mrb[15].mxu1  ;;  %v1610_v26 = vld [vmem:[%s4078_s12 + $0x40] sm:$0xff]  ;;  %v1613_v9 = vld [vmem:[%s4078_s12 + $0x58] sm:$0xff] }
 0x572   :  { %v2596_v33 = vadd.f32 %v1346_v31, %v985_v28  ;;  %v2576_v28 = vpack.c.bf16 %v1611_v27, %v1610_v26  ;;  %v1615_v31 = vld [vmem:[%s4078_s12 + $0x68] sm:$0xff] }
 0x573   :  { %v2524_v34 = vpack.c.bf16 %v2595_v30, %v2593_v11  ;;  %v2579_v11 = vpack.c.bf16 %v1613_v9, %v1612_v29  ;;  %v1614_v30 = vld [vmem:[%s4078_s12 + $0x60] sm:$0xff]  ;;  %v2820_v9 = vld [vmem:[%s4081_s15 + $0x8] sm:$0xff]  }
 0x574   :  { %v2521_v35 = vpack.c.bf16 %v2596_v33, %v2594_v32  ;;  %v2582_v32 = vpack.c.bf16 %v1615_v31, %v1614_v30  ;;  %v1616_v33 = vld [vmem:[%s4078_s12 + $0x70] sm:$0xff]  ;;  %v2822_v30 = vld [vmem:[%s4081_s15 + $0x18] sm:$0xff]   ;;  %v2823_v31 = vld [vmem:[%s4081_s15 + $0x20] sm:$0xff]  }
 0x576   :  { %2523 = vmatprep.subr.msk.bf16.mxu0 %vm2522_vm1, %v2521_v35 }
 0x577   :  { %2526 = vmatpush1.bf16.msk.msra.mxu0 %vm2522_vm1, %v2524_v34 }
 0x578   :  { %2529 = vmatprep.subr.msk.bf16.mxu0 %vm2522_vm1, %v2521_v35 }
 0x57a   :  { %2319 = vmatmul.mubr.msk.f32.vlgmr.msra.gmra.mrb[12].mxu0 %vm1350_vm2, %v1349_v36  ;;  %v1618_v36 = vld [vmem:[%s4078_s12 + $0x80] sm:$0xff] }
 0x57b   :  { %2532 = vmatpush1.bf16.msk.msra.mxu0 %vm2522_vm1, %v2524_v34  ;;  %1499 = vmatprep.mubr.f32.mxu0 %v3090_v48  ;;  %v1617_v34 = vld [vmem:[%s4078_s12 + $0x78] sm:$0xff]  ;;  %v2588_v12 = vpack.c.bf16 %v1619_v8, %v1618_v36  ;;  %v2827_v36 = vld [vmem:[%s4083_s17] sm:$0xff]   ;;  %v2828_v8 = vld [vmem:[%s4083_s17 + $0x8] sm:$0xff]  }
 0x57c   :  { %2533 = vmatprep.subr.bf16.mxu0 %v3091_v50  ;;  %v2585_v35 = vpack.c.bf16 %v1617_v34, %v1616_v33  ;;  %v2825_v33 = vld [vmem:[%s4081_s15 + $0x30] sm:$0xff]   ;;  %v2826_v34 = vld [vmem:[%s4081_s15 + $0x38] ss:$0 sps:$4 sm:$0xff]  }
 0x57e   :  { %2322 = vmatmul.mubr.msk.f32.vlgmr.msra.gmra.mrb[14].mxu0 %vm1350_vm2, %v1431_v14  ;;  %v1620_v14 = vld [vmem:[%s4078_s12 + $0x90] sm:$0xff] }
 0x57f   :  { %2535 = vmatpush1.bf16.msra.mxu0 %v2534_v37  ;;  %v1621_v37 = vld [vmem:[%s4078_s12 + $0x98] sm:$0xff] }
 0x580   :  { %2536 = vmatprep.subr.bf16.mxu0 %v3091_v50  ;;  %v2591_v38 = vpack.c.bf16 %v1621_v37, %v1620_v14 }
 0x583   :  { %2538 = vmatpush1.bf16.msra.mxu0 %v2537_v40  ;;  %v2795_v40 = vld [vmem:[%s4079_s13 + $0x40] sm:$0xff]  }
 0x584   :  { %2539 = vmatprep.subr.bf16.mxu0 %v3091_v50  ;;  %2367 = vmatprep.subr.bf16.mxu1 %v2795_v40 }
 0x585   :  { %2368 = vmatpush3.bf16.msra.mxu1 %v2797_v43 }
 0x587   :  { %2541 = vmatpush1.bf16.msra.mxu0 %v2540_v44  ;;  %v2796_v44 = vld [vmem:[%s4079_s13 + $0x88] sm:$0xff]  }
 0x588   :  { %2542 = vmatprep.subr.bf16.mxu0 %v3091_v50 }
 0x58b   :  { %2544 = vmatpush1.bf16.msra.mxu0 %v2543_v41  ;;  %v2799_v41 = vld [vmem:[%s4079_s13 + $0x90] sm:$0xff]  }
 0x58c   :  { %2545 = vmatprep.subr.bf16.mxu0 %v3091_v50 }
 0x58f   :  { %2547 = vmatpush1.bf16.msra.mxu0 %v2546_v49  ;;  %v2802_v49 = vld [vmem:[%s4079_s13 + $0x98] sm:$0xff]  }
 0x590   :  { %2548 = vmatprep.subr.bf16.mxu0 %v3091_v50 }
 0x593   :  { %2550 = vmatpush1.bf16.msra.mxu0 %v2549_v53  ;;  %v2805_v53 = vld [vmem:[%s4079_s13 + $0xa0] sm:$0xff]  }
 0x594   :  { %2551 = vmatprep.subr.bf16.mxu0 %v3091_v50 }
 0x597   :  { %2553 = vmatpush1.bf16.msra.mxu0 %v2552_v56  ;;  %v2808_v56 = vld [vmem:[%s4079_s13 + $0xa8] sm:$0xff]  }
 0x598   :  { %2554 = vmatprep.subr.bf16.mxu0 %v3091_v50 }
 0x59b   :  { %2556 = vmatpush1.bf16.msra.mxu0 %v2555_v59 }
 0x59c   :  { %2557 = vmatprep.subr.bf16.mxu0 %v3091_v50 }
 0x59f   :  { %2559 = vmatpush1.bf16.msra.mxu0 %v2558_v62 }
 0x5a0   :  { %2560 = vmatprep.subr.bf16.mxu0 %v3091_v50 }
 0x5a3   :  { %2562 = vmatpush1.bf16.msra.mxu0 %v2561_v1  ;;  %v2814_v1 = vld [vmem:[%s4079_s13 + $0xb8] sm:$0xff]  }
 0x5a4   :  { %2563 = vmatprep.subr.bf16.mxu0 %v3091_v50 }
 0x64d   :  { %v1426_v2 = vpop.f32.mrb[12].mxu0 }
 0x64e   :  { %v1428_v3 = vpop.f32.mrb[13].mxu0 }
 0x651   :  { %v1501_v6 = vpop.f32.mrb[14].mxu0 }
 0x652   :  { %v1506_v7 = vmax.f32 %v1426_v2, %v1501_v6  ;;  %v1503_v13 = vpop.f32.mrb[15].mxu0  ;;  %v2815_v2 = vld [vmem:[%s4079_s13 + $0x30] sm:$0xff]  }
 0x653   :  { %v1507_v15 = vmax.f32 %v1428_v3, %v1503_v13  ;;  %v2816_v3 = vld [vmem:[%s4079_s13 + $0x78] sm:$0xff]  }
 0x655   :  { %2323 = vmatprep.mubr.msk.f32.mxu0 %vm1528_vm3, %v1507_v15 }
 0x656   :  { %1597 = vmatmul.mubr.f32.vlgmr.msra.gmra.mrb[16].mxu0 %v1506_v7 }
 0x657   :  { %2565 = vmatpush1.bf16.msra.mxu0 %v2564_v16  ;;  %2324 = vmatprep.mubr.msk.f32.mxu0 %vm1528_vm3, %v1507_v15 }
 0x658   :  { %2566 = vmatprep.subr.bf16.mxu0 %v3091_v50 }
 0x65b   :  { %2568 = vmatpush1.bf16.msra.mxu0 %v2567_v19 }
 0x65c   :  { %2569 = vmatprep.subr.bf16.mxu0 %v3091_v50 }
 0x65f   :  { %2571 = vmatpush1.bf16.msra.mxu0 %v2570_v22 }
 0x660   :  { %2572 = vmatprep.subr.bf16.mxu0 %v3091_v50 }
 0x663   :  { %2574 = vmatpush1.bf16.msra.mxu0 %v2573_v25 }
 0x664   :  { %2575 = vmatprep.subr.bf16.mxu0 %v3091_v50 }
 0x667   :  { %2577 = vmatpush1.bf16.msra.mxu0 %v2576_v28  ;;  %v2819_v28 = vld [vmem:[%s4081_s15] sm:$0xff]  }
 0x668   :  { %2578 = vmatprep.subr.bf16.mxu0 %v3091_v50 }
 0x66b   :  { %2580 = vmatpush1.bf16.msra.mxu0 %v2579_v11  ;;  %v2821_v11 = vld [vmem:[%s4081_s15 + $0x10] sm:$0xff]  }
 0x66c   :  { %2581 = vmatprep.subr.bf16.mxu0 %v3091_v50 }
 0x66f   :  { %2583 = vmatpush1.bf16.msra.mxu0 %v2582_v32  ;;  %v2824_v32 = vld [vmem:[%s4081_s15 + $0x28] sm:$0xff]  }
 0x670   :  { %2584 = vmatprep.subr.bf16.mxu0 %v3091_v50 }
 0x673   :  { %2586 = vmatpush1.bf16.msra.mxu0 %v2585_v35  ;;  %v2073_v35 = vsel %vm260_vm4, %v2826_v34, 0  ;;  %vm2068_vm4 = vcmask 982016  }
 0x674   :  { %2587 = vmatprep.subr.bf16.mxu0 %v3091_v50 }
 0x677   :  { %2589 = vmatpush1.bf16.msra.mxu0 %v2588_v12 }
 0x678   :  { %2590 = vmatprep.subr.bf16.mxu0 %v3091_v50  ;;  %v2798_v50 = vld [vmem:[%s4079_s13 + $0x48] sm:$0xff]   ;;  %s3100_s13 = smov [#allocation17]  }
 0x679   :  { %2369 = vmatprep.subr.bf16.mxu1 %v2798_v50 }
 0x67a   :  { %2370 = vmatpush3.bf16.msra.mxu1 %v2800_v45 }
 0x67b   :  { %2592 = vmatpush1.bf16.msra.mxu0 %v2591_v38  ;;  %2371 = vmatprep.subr.bf16.mxu1 %v2801_v46  ;;  %v1770_v38 = vld [vmem:[%s4080_s14] sm:$0x1] }
 0x67c   :  { %1965 = vmatprep.subr.bf16.mxu0 %v3096_v42 }
 0x67e   :  { %1687 = vmatmul.mubr.f32.vlgmr.msra.gmra.mrb[18].mxu0 %v1506_v7  ;;  %2372 = vmatpush3.bf16.msra.mxu1 %v2803_v10 }
 0x67f   :  { %1966 = vmatpush1.bf16.msra.mxu0 %v2794_v39  ;;  %2373 = vmatprep.subr.bf16.mxu1 %v2804_v47  ;;  %v2829_v47 = vld [vmem:[%s4083_s17 + $0x10] sm:$0xff]  }
 0x680   :  { %1967 = vmatprep.subr.bf16.mxu0 %v3096_v42 }
 0x682   :  { %2374 = vmatpush3.bf16.msra.mxu1 %v2806_v51  ;;  %v2831_v51 = vld [vmem:[%s4083_s17 + $0x20] sm:$0xff]  }
 0x683   :  { %1968 = vmatpush1.bf16.msra.mxu0 %v2796_v44  ;;  %2375 = vmatprep.subr.bf16.mxu1 %v2807_v52  ;;  %v2832_v52 = vld [vmem:[%s4083_s17 + $0x28] ss:$0 sps:$4 sm:$0x33]  }
 0x684   :  { %1969 = vmatprep.subr.bf16.mxu0 %v3096_v42 }
 0x686   :  { %2376 = vmatpush3.bf16.msra.mxu1 %v2809_v54  ;;  %v2022_v54 = vld [vmem:[#allocation14] sm:$0x1] }
 0x687   :  { %1970 = vmatpush1.bf16.msra.mxu0 %v2799_v41  ;;  %2377 = vmatprep.subr.bf16.mxu1 %v2810_v55 }
 0x688   :  { %1971 = vmatprep.subr.bf16.mxu0 %v3096_v42 }
 0x68a   :  { %2378 = vmatpush3.bf16.msra.mxu1 %v2812_v57 }
 0x68b   :  { %1972 = vmatpush1.bf16.msra.mxu0 %v2802_v49  ;;  %2379 = vmatprep.subr.bf16.mxu1 %v2813_v0  ;;  %v2830_v49 = vld [vmem:[%s4083_s17 + $0x18] sm:$0xff]  }
 0x68c   :  { %1973 = vmatprep.subr.bf16.mxu0 %v3096_v42 }
 0x68e   :  { %2380 = vmatpush3.bf16.msra.mxu1 %v2815_v2 }
 0x68f   :  { %1974 = vmatpush1.bf16.msra.mxu0 %v2805_v53  ;;  %2381 = vmatprep.subr.bf16.mxu1 %v2816_v3  ;;  %v2166_v53 = vsel %vm184_vm0, %v2832_v52, 0 }
 0x690   :  { %1975 = vmatprep.subr.bf16.mxu0 %v3096_v42 }
 0x692   :  { %2382 = vmatpush3.bf16.msra.mxu1 %v2818_v5 }
 0x693   :  { %1976 = vmatpush1.bf16.msra.mxu0 %v2808_v56  ;;  %2405 = vmatprep.subr.bf16.mxu1 %v3090_v48 }
 0x694   :  { %1977 = vmatprep.subr.bf16.mxu0 %v3096_v42 }
 0x697   :  { %1978 = vmatpush1.bf16.msra.mxu0 %v2811_v58 }
 0x698   :  { %1979 = vmatprep.subr.bf16.mxu0 %v3096_v42 }
 0x69b   :  { %1980 = vmatpush1.bf16.msra.mxu0 %v2814_v1 }
 0x69c   :  { %1981 = vmatprep.subr.bf16.mxu0 %v3096_v42 }
 0x69f   :  { %1982 = vmatpush1.bf16.msra.mxu0 %v2817_v4 }
 0x6a0   :  { %2425 = vmatprep.subr.bf16.mxu0 %v3090_v48 }
 0x729   :  { %v1598_v59 = vpop.f32.mrb[16].mxu0 }
 0x72a   :  { %v1600_v60 = vpop.f32.mrb[17].mxu0 }
 0x751   :  { %v1688_v61 = vpop.f32.mrb[18].mxu0 }
 0x752   :  { %v1692_v62 = vmax.f32 %v1598_v59, %v1688_v61  ;;  %v1690_v63 = vpop.f32.mrb[19].mxu0 }
 0x754   :  { %2837 = vtanh.f32 %v1692_v62  ;;  %v2128_v62 = vld [vmem:[#allocation16] sm:$0x1] }
 0x75e   :  { %v2838_v6 = vpop.eup %2837 }
 0x75f   :  { %v1699_v7 = vrot.slane %v2838_v6, 2  ;;  %v1695_v13 = vrot.slane %v2838_v6, 1  ;;  %v1707_v15 = vrot.slane %v2838_v6, 4  ;;  %v1703_v16 = vrot.slane %v2838_v6, 3 }
 0x761   :  { %1700 = vrot.lane.b32.xlu1 %v1699_v7, %s3097_s28  ;;  %1696 = vrot.lane.b32.xlu0 %v1695_v13, %s3094_s6  ;;  %s2215_s6 = sshll.u32 %s3100_s13, 4  ;;  %s2216_s6 = int_to_ptr.vmem [resolvable:$true] %s2215_s6 }
 0x762   :  { %s3041_s17 = scalar_lea.vmem %s2216_s6, 16  ;;  %p3046_p3 = scmp.lt.s32.totalorder %s2216_s6, %s2216_s6 }
 0x763   :  { %p3042_p2 = scmp.ne.s32.totalorder %s2216_s6, %s3041_s17 }
 0x765   :  { %1708 = vrot.lane.b32.xlu1 %v1707_v15, %s3098_s29  ;;  %1704 = vrot.lane.b32.xlu0 %v1703_v16, %s3089_s1  ;;  %s3045_s1 = scalar_lea.vmem %s2216_s6, 32 }
 0x766   :  { %p3047_p4 = scmp.lt.s32.totalorder %s3045_s1, %s3041_s17 }
 0x768   :  { %p3048_p5 = por %p3047_p4, %p3046_p3 }
 0x76a   :  { %p3049_p6 = pnand %p3048_p5, %p3042_p2 }
 0x7d3   :  { %v1701_v17 = vpop.permute.xlu1 %1700  ;;  %v1697_v18 = vpop.permute.xlu0 %1696 }
 0x7d4   :  { %v1711_v19 = vsel %vm916_vm15, %v2838_v6, %v1697_v18  ;;  %v1712_v20 = vsel %vm1528_vm3, %v1697_v18, %v1701_v17 }
 0x7d5   :  { %v1716_v29 = vpack.c.bf16 %v1711_v19, %v1711_v19 }
 0x7d7   :  { %v1709_v21 = vpop.permute.xlu1 %1708  ;;  %v1705_v22 = vpop.permute.xlu0 %1704 }
 0x7d8   :  { %v1719_v23 = vpack.c.bf16 %v1709_v21, %v1709_v21  ;;  %v1713_v24 = vsel %vm295_vm8, %v1712_v20, %v1705_v22  ;;  %v1715_v25 = vsel %vm1714_vm5, %v1705_v22, %v1709_v21  ;;  %vm3099_vm8 = vmmov 0  }
 0x7d9   :  { %v1717_v26 = vpack.c.bf16 %v1713_v24, %v1713_v24  ;;  %v1718_v27 = vpack.c.bf16 %v1715_v25, %v1715_v25 }
 0x7da   :  { %2350 = vmatprep.mubr.msk.bf16.mxu0 %vm1921_vm6, %v1719_v23 }
 0x7db   :  { %1957 = vmatprep.mubr.bf16.mxu1 %v1717_v26  ;;  %1998 = vmatmul.mubr.bf16.vlgmr.msra.gmra.mrb[20].mxu0 %v1718_v27 }
 0x7dc   :  { %1958 = vmatmul.mubr.bf16.vlgmr.msra.gmra.mrb[16].mxu1 %v1716_v29  ;;  %2437 = vmatprep.mubr.msk.bf16.mxu0 %vm3099_vm8, %v3090_v48 }
 0x7dd   :  { %2406 = vmatpush3.bf16.msra.mxu1 %v2819_v28  ;;  %2421 = vmatprep.mubr.msk.bf16.mxu1 %vm3099_vm8, %v3090_v48 }
 0x7de   :  { %2407 = vmatprep.subr.bf16.mxu1 %v3090_v48  ;;  %2426 = vmatpush3.bf16.msra.mxu0 %v2827_v36 }
 0x7df   :  { %2427 = vmatprep.subr.bf16.mxu0 %v3090_v48 }
 0x7e1   :  { %2408 = vmatpush3.bf16.msra.mxu1 %v2820_v9 }
 0x7e2   :  { %2409 = vmatprep.subr.bf16.mxu1 %v3090_v48  ;;  %2428 = vmatpush3.bf16.msra.mxu0 %v2828_v8 }
 0x7e3   :  { %2429 = vmatprep.subr.bf16.mxu0 %v3090_v48 }
 0x7e5   :  { %2410 = vmatpush3.bf16.msra.mxu1 %v2821_v11 }
 0x7e6   :  { %2411 = vmatprep.subr.bf16.mxu1 %v3090_v48  ;;  %2430 = vmatpush3.bf16.msra.mxu0 %v2829_v47 }
 0x7e7   :  { %2431 = vmatprep.subr.bf16.mxu0 %v3090_v48 }
 0x7e9   :  { %2412 = vmatpush3.bf16.msra.mxu1 %v2822_v30 }
 0x7ea   :  { %2413 = vmatprep.subr.bf16.mxu1 %v3090_v48  ;;  %2432 = vmatpush3.bf16.msra.mxu0 %v2830_v49 }
 0x7eb   :  { %2433 = vmatprep.subr.bf16.mxu0 %v3090_v48 }
 0x7ed   :  { %2414 = vmatpush3.bf16.msra.mxu1 %v2823_v31 }
 0x7ee   :  { %2415 = vmatprep.subr.bf16.mxu1 %v3090_v48  ;;  %2434 = vmatpush3.bf16.msra.mxu0 %v2831_v51 }
 0x7ef   :  { %2435 = vmatprep.subr.bf16.mxu0 %v3090_v48 }
 0x7f1   :  { %2416 = vmatpush3.bf16.msra.mxu1 %v2824_v32 }
 0x7f2   :  { %2417 = vmatprep.subr.bf16.mxu1 %v3090_v48  ;;  %2436 = vmatpush3.bf16.msra.mxu0 %v2166_v53 }
 0x7f5   :  { %2418 = vmatpush3.bf16.msra.mxu1 %v2825_v33 }
 0x7f6   :  { %2419 = vmatprep.subr.bf16.mxu1 %v3090_v48 }
 0x7f9   :  { %2420 = vmatpush3.bf16.msra.mxu1 %v2073_v35 }
 0x8ae   :  { %v1999_v12 = vpop.f32.mrb[20].mxu0 }
 0x8af   :  { %v2383_v14 = vpop.f32.mrb[16].mxu1  ;;  %v2001_v37 = vpop.f32.mrb[21].mxu0 }
 0x8b0   :  { %v2384_v39 = vpop.f32.mrb[17].mxu1  ;;  %v2002_v40 = vpop.f32.mrb[22].mxu0 }
 0x8b1   :  { %v2385_v42 = vadd.f32 %v2384_v39, %v2383_v14  ;;  %v2386_v43 = vpop.f32.mrb[18].mxu1  ;;  %v2003_v50 = vpop.f32.mrb[23].mxu0 }
 0x8b2   :  { %v2387_v44 = vpop.f32.mrb[19].mxu1 }
 0x8b3   :  { %v1960_v45 = vadd.f32 %v2385_v42, %v1770_v38 }
 0x8b5   :  { %v2000_v46 = vadd.f32 %v1999_v12, %v1960_v45 }
 0x8b7   :  { %2839 = vtanh.f32 %v2000_v46 }
 0x8c1   :  { %v2840_v41 = vpop.eup %2839 }
 0x8c2   :  { %v2006_v10 = vpack.c.bf16 %v2840_v41, %v2840_v41 }
 0x8c4   :  { %2422 = vmatmul.mubr.msk.bf16.vlgmr.msra.gmra.mrb[20].mxu1 %vm2068_vm4, %v2006_v10 }
 0x997   :  { %v2109_v55 = vpop.f32.mrb[20].mxu1 }
 0x998   :  { %v2110_v56 = vadd.f32 %v2109_v55, %v2022_v54  ;;  %v2423_v57 = vpop.f32.mrb[21].mxu1 }
 0x999   :  { %v2112_v58 = vpop.f32.mrb[22].mxu1 }
 0x99a   :  { %2841 = vtanh.f32 %v2110_v56  ;;  %v2424_v59 = vpop.f32.mrb[23].mxu1 }
 0x9a4   :  { %v2842_v60 = vpop.eup %2841 }
 0x9a5   :  { %v2116_v61 = vpack.c.bf16 %v2842_v60, %v2842_v60 }
 0x9a7   :  { %2438 = vmatmul.mubr.msk.bf16.vlgmr.msra.gmra.mrb[24].mxu0 %vm290_vm7, %v2116_v61 }
 0xa7a   :  { %v2202_v48 = vpop.f32.mrb[24].mxu0 }
 0xa7b   :  { %v2203_v63 = vadd.f32 %v2202_v48, %v2128_v62  ;;  %v2439_v0 = vpop.f32.mrb[25].mxu0 }
 0xa7c   :  { %v2205_v1 = vpop.f32.mrb[26].mxu0 }
 0xa7d   :  { %2208 = vst [vmem:[#allocation17] sm:$0x1] %v2203_v63  ;;  %v2440_v2 = vpop.f32.mrb[27].mxu0 }
 0xa7e   :  { %3052 = shalt.err (!%p3049_p6)
}
 0xa7f   :  { %s4099_s10 = sld [smem:[#allocation28_spill]] }
 0xa85   :  { %s3053_s22 = scalar_lea.hbm %s4099_s10, 16 }
 0xa86   :  { %p3054_p7 = scmp.ne.s32.totalorder %s4099_s10, %s3053_s22  ;;  %p3057_p8 = scmp.lt.u32.totalorder %s3053_s22, %s4099_s10 }
 0xa88   :  { %p3059_p9 = pnand %p3057_p8, %p3054_p7 }
 0xa8a   :  { %3062 = shalt.err (!%p3059_p9)
}
 0xa8b   :  { %2218 = dma.vmem_to_hbm [thread:$0]  %s2216_s6, 16, %s4099_s10, [#allocation4]  }
 0xa8c   :  { %3073 = dma.done.wait [#allocation4], 16  }
 0xa8d   :  { %3074 = vsyncadd [#allocation4], 4294967280 }
 0xa8e   :  { %2222 = vsyncpa [#allocation3], 1 }
 0xa8f   :  { %2223 = vsyncpa [#allocation6], 1 }
 0xa90   :  { %2224 = vsyncpa [#allocation9], 1 }
 0xa91   :  { %2225 = vsyncpa [#allocation12], 1 }
 0xa92   :  { %2226 = vsyncpa [#allocation15], 1 }
 0xa93   :  { %2227 = vsyncpa [#allocation4], 1 }

</bundles_post_ra>
